<compile_context>
chip_gen: v7x
topology: tpu7x:2x2x1
jax: 0.10.0
libtpu: 0.0.40
codegen_flags: <defaults>
</compile_context>

<pallas_src>
import math

import jax
import jax.numpy as jnp
from jax.experimental import pallas as pl
from jax.experimental.pallas import tpu as pltpu

# ----------------------------- config (small synthetic ViT) ------------------
PATCH = 14                         # DINOv2 patch size (fixed by model family)
IMG = 28                           # small image, multiple of 14
CIN = 3                            # RGB (required by the ImageNet normalize)
D = 32                             # embed dim (synthetic stand-in for 384 of vits14)
HEADS = 2
HEAD_DIM = D // HEADS
MLP_HIDDEN = 4 * D
DEPTH = 2                          # synthetic depth (stands in for 12 blocks)
EPS = 1e-6                         # DINOv2 LayerNorm eps
NUM_PATCHES = (IMG // PATCH) ** 2  # 4
N_TOK = NUM_PATCHES + 1            # 5
N_PAD = ((N_TOK + 7) // 8) * 8     # 8   -> sublane (8) aligned token slab
K_RAW = CIN * PATCH * PATCH        # 588
K_PAD = ((K_RAW + 127) // 128) * 128   # 640 -> lane (128) aligned patch vector

IMAGENET_MEAN = jnp.array([0.485, 0.456, 0.406], jnp.float32)
IMAGENET_STD = jnp.array([0.229, 0.224, 0.225], jnp.float32)

PARAM_ORDER = (
    "patch_w", "patch_b", "cls_pos", "patch_pos",
    "ln1_g", "ln1_b", "qkv_w", "qkv_b", "proj_w", "proj_b", "ls1",
    "ln2_g", "ln2_b", "fc1_w", "fc1_b", "fc2_w", "fc2_b", "ls2",
    "norm_g", "norm_b",
)


def _layernorm(x, g, b):
    mu = jnp.mean(x, axis=-1, keepdims=True)
    var = jnp.mean((x - mu) ** 2, axis=-1, keepdims=True)
    return (x - mu) * jax.lax.rsqrt(var + EPS) * g + b


def _gelu_exact(x):
    return 0.5 * x * (1.0 + jax.lax.erf(x * (1.0 / math.sqrt(2.0))))


# ----------------------------- fused Pallas kernel (one batch item / step) ---
def _fused_kernel(patches_ref, pw_ref, pb_ref, clspos_ref, ppos_ref,
                  ln1_g_ref, ln1_b_ref, qkv_w_ref, qkv_b_ref, proj_w_ref,
                  proj_b_ref, ls1_ref, ln2_g_ref, ln2_b_ref, fc1_w_ref,
                  fc1_b_ref, fc2_w_ref, fc2_b_ref, ls2_ref,
                  norm_g_ref, norm_b_ref, out_ref):
    f32, bf16 = jnp.float32, jnp.bfloat16

    # --- patch embed (ImageNet x/255+normalize folded into pw/pb at init):
    #     (NUM_PATCHES, K_PAD)bf16 @ (K_PAD, D)bf16 -> f32 ---
    emb = jnp.dot(patches_ref[...], pw_ref[...],
                  preferred_element_type=f32) + pb_ref[...]             # (NP, D)

    # --- token slab, built ONCE per grid step: [CLS+pos0, patches+pos1:, zero pad] ---
    x = jnp.concatenate(
        [clspos_ref[...], emb + ppos_ref[...],
         jnp.zeros((N_PAD - N_TOK, D), f32)], axis=0)                   # (N_PAD, D) f32

    # additive key mask: padded key columns -> -1e30 so softmax weight ~ 0.
    # Padded query rows compute garbage that never leaks (only CLS row is output).
    key_ids = jax.lax.broadcasted_iota(jnp.int32, (1, 1, N_PAD), 2)
    key_mask = jnp.where(key_ids < N_TOK, 0.0, -1e30).astype(f32)

    def block(d, x):
        # ------------------------- attention branch -------------------------
        # 1/sqrt(HEAD_DIM) is pre-folded into the Q slice of qkv_w / qkv_b.
        xn = _layernorm(x, ln1_g_ref[d], ln1_b_ref[d])
        qkv = jnp.dot(xn.astype(bf16), qkv_w_ref[d],
                      preferred_element_type=f32) + qkv_b_ref[d]        # (N_PAD, 3D)
        # one reshape + transpose per tensor (no per-head slice/stack gathers)
        qh = qkv[:, 0 * D:1 * D].reshape(N_PAD, HEADS, HEAD_DIM).transpose(1, 0, 2)
        kh = qkv[:, 1 * D:2 * D].reshape(N_PAD, HEADS, HEAD_DIM).transpose(1, 0, 2)
        vh = qkv[:, 2 * D:3 * D].reshape(N_PAD, HEADS, HEAD_DIM).transpose(1, 0, 2)
        s = jnp.einsum("hqd,hkd->hqk", qh.astype(bf16), kh.astype(bf16),
                       preferred_element_type=f32) + key_mask           # (H, N_PAD, N_PAD)
        s = s - jnp.max(s, axis=-1, keepdims=True)
        p = jnp.exp(s)
        p = p * pl.reciprocal(jnp.sum(p, axis=-1, keepdims=True), approx=True)
        ctx = jnp.einsum("hqk,hkd->hqd", p.astype(bf16), vh.astype(bf16),
                         preferred_element_type=f32)                    # (H, N_PAD, HD)
        attn = ctx.transpose(1, 0, 2).reshape(N_PAD, D)                 # merge heads
        attn = jnp.dot(attn.astype(bf16), proj_w_ref[d],
                       preferred_element_type=f32) + proj_b_ref[d]
        x = x + ls1_ref[d] * attn                                       # f32 residual

        # ------------------------- MLP branch --------------------------------
        xn = _layernorm(x, ln2_g_ref[d], ln2_b_ref[d])
        h1 = jnp.dot(xn.astype(bf16), fc1_w_ref[d],
                     preferred_element_type=f32) + fc1_b_ref[d]
        h1 = _gelu_exact(h1)
        h2 = jnp.dot(h1.astype(bf16), fc2_w_ref[d],
                     preferred_element_type=f32) + fc2_b_ref[d]
        return x + ls2_ref[d] * h2

    # real loop (not Python unroll) with dynamic first-axis weight indexing:
    # bounds live ranges / trace size; at real DEPTH=12 convert this to a grid axis.
    x = jax.lax.fori_loop(0, DEPTH, block, x)

    # --- final LayerNorm on the CLS row only -> (1, D) output block ---
    out_ref[...] = _layernorm(x[0:1, :], norm_g_ref[...], norm_b_ref[...])


# ----------------------------- host-side glue --------------------------------
def patchify(x):
    """NCHW f32 -> (B, NUM_PATCHES, K_PAD) bf16; per-patch vector order (c, ph, pw)
    matches the flattened Conv2d patch-embed weight. Lane-padded 588 -> 640 and cast
    to bf16 host-side (plain XLA reshape/transpose/pad glue)."""
    B = x.shape[0]
    g = IMG // PATCH
    x = x.reshape(B, CIN, g, PATCH, g, PATCH)
    x = x.transpose(0, 2, 4, 1, 3, 5)                   # (B, gh, gw, C, ph, pw)
    p = x.reshape(B, NUM_PATCHES, K_RAW)
    p = jnp.pad(p, ((0, 0), (0, 0), (0, K_PAD - K_RAW)))
    return p.astype(jnp.bfloat16)


def dinov2_forward(x, params):
    """Whole forward in a single pallas_call; the per-batch token slab stays on-chip
    across all layers, batch is a parallel grid axis (megacore + DMA pipelining)."""
    B = x.shape[0]
    patches = patchify(x)                               # (B, NUM_PATCHES, K_PAD) bf16
    flat = tuple(params[k] for k in PARAM_ORDER)

    def const_spec(a):                                  # weights: fetched once
        nd = a.ndim
        return pl.BlockSpec(a.shape, lambda b, nd=nd: (0,) * nd)

    out = pl.pallas_call(
        _fused_kernel,
        grid=(B,),
        in_specs=[pl.BlockSpec((None, NUM_PATCHES, K_PAD), lambda b: (b, 0, 0))]
                 + [const_spec(a) for a in flat],
        out_specs=pl.BlockSpec((None, 1, D), lambda b: (b, 0, 0)),
        out_shape=jax.ShapeDtypeStruct((B, 1, D), jnp.float32),
        compiler_params=pltpu.CompilerParams(
            dimension_semantics=("parallel",),
            # tiny footprint here; at real size either stream weights over a depth
            # grid axis (v7x: 64 MiB physical VMEM) or set this from the computed
            # resident footprint (v6e/v5e: 128 MiB physical, 32/16 MiB default scoped).
            vmem_limit_bytes=32 * 1024 * 1024,
        ),
    )(patches, *flat)
    return out.reshape(B, D)


# ----------------------------- parameters ------------------------------------
def init_raw_params(key):
    """Raw (PyTorch-style) parameters; biases/LN/LayerScale randomized so the folds
    (including the Q-slice bias scaling) are actually exercised by the reference test."""
    ks = iter(jax.random.split(key, 64))

    def nrm(shape, std=0.02):
        return std * jax.random.normal(next(ks), shape, jnp.float32)

    raw = {
        "patch_w": nrm((K_RAW, D)),            # Conv2d weight flattened as (C*14*14, D)
        "patch_b": nrm((1, D)),
        "cls_token": nrm((1, 1, D)),
        "pos_embed": nrm((1, N_TOK, D)),
        # TODO(synk): DINOv2 bicubically interpolates pos_embed for non-default image
        # sizes; the grid here matches the learned grid so no interpolation is needed.
        "norm_g": 1.0 + nrm((1, D), 0.05),
        "norm_b": nrm((1, D), 0.05),
    }
    blk = {k: [] for k in ("ln1_g", "ln1_b", "qkv_w", "qkv_b", "proj_w", "proj_b",
                           "ls1", "ln2_g", "ln2_b", "fc1_w", "fc1_b", "fc2_w",
                           "fc2_b", "ls2")}
    for _ in range(DEPTH):
        blk["ln1_g"].append(1.0 + nrm((1, D), 0.05))
        blk["ln1_b"].append(nrm((1, D), 0.05))
        blk["qkv_w"].append(nrm((D, 3 * D)))
        blk["qkv_b"].append(nrm((1, 3 * D)))            # nonzero -> tests Q-bias scaling
        blk["proj_w"].append(nrm((D, D)))
        blk["proj_b"].append(nrm((1, D)))
        blk["ls1"].append(1.0 + nrm((1, D), 0.1))       # LayerScale gamma
        blk["ln2_g"].append(1.0 + nrm((1, D), 0.05))
        blk["ln2_b"].append(nrm((1, D), 0.05))
        blk["fc1_w"].append(nrm((D, MLP_HIDDEN)))
        blk["fc1_b"].append(nrm((1, MLP_HIDDEN)))
        blk["fc2_w"].append(nrm((MLP_HIDDEN, D)))
        blk["fc2_b"].append(nrm((1, D)))
        blk["ls2"].append(1.0 + nrm((1, D), 0.1))
    for k, v in blk.items():
        raw[k] = jnp.stack(v, axis=0)                   # leading DEPTH axis
    return raw


def fold_params(raw):
    """One-time constant folds on parameters (not per call):
       (x/255 - mean)/std  -> folded into patch W (scaled rows) and patch b,
       1/sqrt(head_dim)    -> folded into the Q output slice of qkv W and b,
       CLS + pos[0]        -> pre-added; pos[1:] kept separately.
       Matmul weights stored bf16 (MXU native); biases/LN/LayerScale stay f32."""
    bf16 = jnp.bfloat16
    scale_vec = jnp.repeat(1.0 / (255.0 * IMAGENET_STD), PATCH * PATCH)   # (588,)
    bias_vec = jnp.repeat(-IMAGENET_MEAN / IMAGENET_STD, PATCH * PATCH)   # (588,)
    pw = raw["patch_w"] * scale_vec[:, None]
    pw = jnp.pad(pw, ((0, K_PAD - K_RAW), (0, 0)))       # lane-pad 588 -> 640 with zeros
    pb = raw["patch_b"] + bias_vec[None, :] @ raw["patch_w"]

    qkv_scale = jnp.concatenate(
        [jnp.full((D,), HEAD_DIM ** -0.5, jnp.float32), jnp.ones((2 * D,), jnp.float32)])

    return {
        "patch_w": pw.astype(bf16),
        "patch_b": pb,
        "cls_pos": raw["cls_token"][0] + raw["pos_embed"][0, :1],   # (1, D)
        "patch_pos": raw["pos_embed"][0, 1:],                       # (NUM_PATCHES, D)
        "ln1_g": raw["ln1_g"], "ln1_b": raw["ln1_b"],
        "qkv_w": (raw["qkv_w"] * qkv_scale[None, None, :]).astype(bf16),
        "qkv_b": raw["qkv_b"] * qkv_scale[None, None, :],
        "proj_w": raw["proj_w"].astype(bf16), "proj_b": raw["proj_b"],
        "ls1": raw["ls1"],
        "ln2_g": raw["ln2_g"], "ln2_b": raw["ln2_b"],
        "fc1_w": raw["fc1_w"].astype(bf16), "fc1_b": raw["fc1_b"],
        "fc2_w": raw["fc2_w"].astype(bf16), "fc2_b": raw["fc2_b"],
        "ls2": raw["ls2"],
        "norm_g": raw["norm_g"], "norm_b": raw["norm_b"],
    }


# ----------------------------- pure-JAX f32 reference (PyTorch math) ---------
def reference_forward(x, raw):
    B = x.shape[0]
    xn = x / 255.0
    xn = (xn - IMAGENET_MEAN.reshape(1, CIN, 1, 1)) / IMAGENET_STD.reshape(1, CIN, 1, 1)
    g = IMG // PATCH
    p = xn.reshape(B, CIN, g, PATCH, g, PATCH).transpose(0, 2, 4, 1, 3, 5)
    p = p.reshape(B, NUM_PATCHES, K_RAW)
    emb = p @ raw["patch_w"] + raw["patch_b"]                           # (B, NP, D)
    cls = jnp.broadcast_to(raw["cls_token"], (B, 1, D))
    t = jnp.concatenate([cls, emb], axis=1) + raw["pos_embed"]          # (B, N_TOK, D)
    for d in range(DEPTH):
        h = _layernorm(t, raw["ln1_g"][d], raw["ln1_b"][d])
        qkv = h @ raw["qkv_w"][d] + raw["qkv_b"][d]
        q, k, v = jnp.split(qkv, 3, axis=-1)
        q = q.reshape(B, N_TOK, HEADS, HEAD_DIM).transpose(0, 2, 1, 3)
        k = k.reshape(B, N_TOK, HEADS, HEAD_DIM).transpose(0, 2, 1, 3)
        v = v.reshape(B, N_TOK, HEADS, HEAD_DIM).transpose(0, 2, 1, 3)
        s = jnp.einsum("bhqd,bhkd->bhqk", q, k) * (HEAD_DIM ** -0.5)
        a = jax.nn.softmax(s, axis=-1)
        ctx = jnp.einsum("bhqk,bhkd->bhqd", a, v).transpose(0, 2, 1, 3).reshape(B, N_TOK, D)
        t = t + raw["ls1"][d] * (ctx @ raw["proj_w"][d] + raw["proj_b"][d])
        h = _layernorm(t, raw["ln2_g"][d], raw["ln2_b"][d])
        m = _gelu_exact(h @ raw["fc1_w"][d] + raw["fc1_b"][d])
        t = t + raw["ls2"][d] * (m @ raw["fc2_w"][d] + raw["fc2_b"][d])
    t = _layernorm(t, raw["norm_g"], raw["norm_b"])
    return t[:, 0, :]                                                   # CLS -> (B, D)


if __name__ == "__main__":
    key = jax.random.PRNGKey(0)
    k_in, k_par = jax.random.split(key)
    # raw "uint8-style" image values in [0, 255), NCHW like the PyTorch module
    x = jax.random.uniform(k_in, (2, CIN, IMG, IMG), jnp.float32, 0.0, 255.0)
    raw = init_raw_params(k_par)
    params = fold_params(raw)

    out = jax.jit(dinov2_forward)(x, params)
    out = jax.block_until_ready(out)
    assert out.shape == (2, D) and out.dtype == jnp.float32
    assert bool(jnp.all(jnp.isfinite(out)))

    # tolerance test vs the pure-JAX f32 reference using UNfolded params (kernel uses
    # bf16 matmul operands + EUP approx reciprocal -> loose tolerance).
    ref = jax.jit(reference_forward)(x, raw)
    err = float(jnp.max(jnp.abs(out - ref)))
    assert err < 1e-1, f"max abs error vs reference: {err}"

    print("KERNEL_OK")
</pallas_src>

<mosaic_0001>
module attributes {stable_mosaic.version = 11 : i64} {
  func.func @_fused_kernel(%arg0: i32, %arg1: memref<1x4x640xbf16, #tpu.memory_space<vmem>>, %arg2: memref<640x32xbf16, #tpu.memory_space<vmem>>, %arg3: memref<1x32xf32, #tpu.memory_space<vmem>>, %arg4: memref<1x32xf32, #tpu.memory_space<vmem>>, %arg5: memref<4x32xf32, #tpu.memory_space<vmem>>, %arg6: memref<2x1x32xf32, #tpu.memory_space<vmem>>, %arg7: memref<2x1x32xf32, #tpu.memory_space<vmem>>, %arg8: memref<2x32x96xbf16, #tpu.memory_space<vmem>>, %arg9: memref<2x1x96xf32, #tpu.memory_space<vmem>>, %arg10: memref<2x32x32xbf16, #tpu.memory_space<vmem>>, %arg11: memref<2x1x32xf32, #tpu.memory_space<vmem>>, %arg12: memref<2x1x32xf32, #tpu.memory_space<vmem>>, %arg13: memref<2x1x32xf32, #tpu.memory_space<vmem>>, %arg14: memref<2x1x32xf32, #tpu.memory_space<vmem>>, %arg15: memref<2x32x128xbf16, #tpu.memory_space<vmem>>, %arg16: memref<2x1x128xf32, #tpu.memory_space<vmem>>, %arg17: memref<2x128x32xbf16, #tpu.memory_space<vmem>>, %arg18: memref<2x1x32xf32, #tpu.memory_space<vmem>>, %arg19: memref<2x1x32xf32, #tpu.memory_space<vmem>>, %arg20: memref<1x32xf32, #tpu.memory_space<vmem>>, %arg21: memref<1x32xf32, #tpu.memory_space<vmem>>, %arg22: memref<1x1x32xf32, #tpu.memory_space<vmem>>) attributes {dimension_semantics = [#tpu.dimension_semantics<parallel>], iteration_bounds = array<i64: 2>, scalar_prefetch = 0 : i64, scratch_operands = 0 : i64, tpu.core_type = #tpu.core_type<tc>, window_params = [{transform_indices = @transform_0, window_bounds = array<i64: 1, 4, 640>}, {pipeline_mode = #tpu.pipeline_mode<synchronous>, transform_indices = @transform_1, window_bounds = array<i64: 640, 32>}, {pipeline_mode = #tpu.pipeline_mode<synchronous>, transform_indices = @transform_2, window_bounds = array<i64: 1, 32>}, {pipeline_mode = #tpu.pipeline_mode<synchronous>, transform_indices = @transform_3, window_bounds = array<i64: 1, 32>}, {pipeline_mode = #tpu.pipeline_mode<synchronous>, transform_indices = @transform_4, window_bounds = array<i64: 4, 32>}, {pipeline_mode = #tpu.pipeline_mode<synchronous>, transform_indices = @transform_5, window_bounds = array<i64: 2, 1, 32>}, {pipeline_mode = #tpu.pipeline_mode<synchronous>, transform_indices = @transform_6, window_bounds = array<i64: 2, 1, 32>}, {pipeline_mode = #tpu.pipeline_mode<synchronous>, transform_indices = @transform_7, window_bounds = array<i64: 2, 32, 96>}, {pipeline_mode = #tpu.pipeline_mode<synchronous>, transform_indices = @transform_8, window_bounds = array<i64: 2, 1, 96>}, {pipeline_mode = #tpu.pipeline_mode<synchronous>, transform_indices = @transform_9, window_bounds = array<i64: 2, 32, 32>}, {pipeline_mode = #tpu.pipeline_mode<synchronous>, transform_indices = @transform_10, window_bounds = array<i64: 2, 1, 32>}, {pipeline_mode = #tpu.pipeline_mode<synchronous>, transform_indices = @transform_11, window_bounds = array<i64: 2, 1, 32>}, {pipeline_mode = #tpu.pipeline_mode<synchronous>, transform_indices = @transform_12, window_bounds = array<i64: 2, 1, 32>}, {pipeline_mode = #tpu.pipeline_mode<synchronous>, transform_indices = @transform_13, window_bounds = array<i64: 2, 1, 32>}, {pipeline_mode = #tpu.pipeline_mode<synchronous>, transform_indices = @transform_14, window_bounds = array<i64: 2, 32, 128>}, {pipeline_mode = #tpu.pipeline_mode<synchronous>, transform_indices = @transform_15, window_bounds = array<i64: 2, 1, 128>}, {pipeline_mode = #tpu.pipeline_mode<synchronous>, transform_indices = @transform_16, window_bounds = array<i64: 2, 128, 32>}, {pipeline_mode = #tpu.pipeline_mode<synchronous>, transform_indices = @transform_17, window_bounds = array<i64: 2, 1, 32>}, {pipeline_mode = #tpu.pipeline_mode<synchronous>, transform_indices = @transform_18, window_bounds = array<i64: 2, 1, 32>}, {pipeline_mode = #tpu.pipeline_mode<synchronous>, transform_indices = @transform_19, window_bounds = array<i64: 1, 32>}, {pipeline_mode = #tpu.pipeline_mode<synchronous>, transform_indices = @transform_20, window_bounds = array<i64: 1, 32>}, {transform_indices = @transform_21, window_bounds = array<i64: 1, 1, 32>}]} {
    %c0 = arith.constant 0 : index
    %c0_0 = arith.constant 0 : index
    %c0_1 = arith.constant 0 : index
    %0 = vector.load %arg1[%c0, %c0_0, %c0_1] : memref<1x4x640xbf16, #tpu.memory_space<vmem>>, vector<1x4x640xbf16>
    %1 = vector.shape_cast %0 : vector<1x4x640xbf16> to vector<4x640xbf16>
    %c0_2 = arith.constant 0 : index
    %c0_3 = arith.constant 0 : index
    %2 = vector.load %arg2[%c0_2, %c0_3] : memref<640x32xbf16, #tpu.memory_space<vmem>>, vector<640x32xbf16>
    %cst = arith.constant dense<0.000000e+00> : vector<4x32xf32>
    %3 = tpu.matmul %1, %2, %cst {dimension_numbers = #tpu.dot_dimension_numbers<[1], [0], [0], [1], [0, 0, 1, 1], [], []>} : vector<4x640xbf16>, vector<640x32xbf16>, vector<4x32xf32> -> vector<4x32xf32>
    %c0_4 = arith.constant 0 : index
    %c0_5 = arith.constant 0 : index
    %4 = vector.load %arg3[%c0_4, %c0_5] : memref<1x32xf32, #tpu.memory_space<vmem>>, vector<1x32xf32>
    %5 = vector.broadcast %4 : vector<1x32xf32> to vector<4x32xf32>
    %6 = arith.addf %3, %5 : vector<4x32xf32>
    %c0_6 = arith.constant 0 : index
    %c0_7 = arith.constant 0 : index
    %7 = vector.load %arg4[%c0_6, %c0_7] : memref<1x32xf32, #tpu.memory_space<vmem>>, vector<1x32xf32>
    %c0_8 = arith.constant 0 : index
    %c0_9 = arith.constant 0 : index
    %8 = vector.load %arg5[%c0_8, %c0_9] : memref<4x32xf32, #tpu.memory_space<vmem>>, vector<4x32xf32>
    %9 = arith.addf %6, %8 : vector<4x32xf32>
    %cst_10 = arith.constant 0.000000e+00 : f32
    %10 = vector.broadcast %cst_10 : f32 to vector<3x32xf32>
    %11 = tpu.concatenate %7, %9, %10 in 0 : vector<1x32xf32>, vector<4x32xf32>, vector<3x32xf32> -> vector<8x32xf32>
    %12 = tpu.iota {dimensions = array<i32: 2>} : vector<1x1x8xi32>
    %c5_i32 = arith.constant 5 : i32
    %13 = vector.broadcast %c5_i32 : i32 to vector<1x1x8xi32>
    %14 = arith.cmpi slt, %12, %13 : vector<1x1x8xi32>
    %cst_11 = arith.constant 0.000000e+00 : f32
    %cst_12 = arith.constant -1.000000e+30 : f32
    %15 = vector.broadcast %cst_11 : f32 to vector<1x1x8xf32>
    %16 = vector.broadcast %cst_12 : f32 to vector<1x1x8xf32>
    %17 = arith.select %14, %15, %16 : vector<1x1x8xi1>, vector<1x1x8xf32>
    %c0_i32 = arith.constant 0 : i32
    %c2_i32 = arith.constant 2 : i32
    %18 = arith.addi %c0_i32, %c2_i32 : i32
    %c1_i32 = arith.constant 1 : i32
    %19 = scf.for %arg23 = %c0_i32 to %18 step %c1_i32 iter_args(%arg24 = %11) -> (vector<8x32xf32>)  : i32 {
      %46 = arith.index_cast %arg23 : i32 to index
      %c0_26 = arith.constant 0 : index
      %c0_27 = arith.constant 0 : index
      %47 = vector.load %arg6[%46, %c0_26, %c0_27] : memref<2x1x32xf32, #tpu.memory_space<vmem>>, vector<1x1x32xf32>
      %48 = vector.shape_cast %47 : vector<1x1x32xf32> to vector<1x32xf32>
      %49 = arith.index_cast %arg23 : i32 to index
      %c0_28 = arith.constant 0 : index
      %c0_29 = arith.constant 0 : index
      %50 = vector.load %arg7[%49, %c0_28, %c0_29] : memref<2x1x32xf32, #tpu.memory_space<vmem>>, vector<1x1x32xf32>
      %51 = vector.shape_cast %50 : vector<1x1x32xf32> to vector<1x32xf32>
      %cst_30 = arith.constant dense<0.000000e+00> : vector<8xf32>
      %52 = vector.multi_reduction <add>, %arg24, %cst_30 [1] : vector<8x32xf32> to vector<8xf32>
      %53 = vector.shape_cast %52 : vector<8xf32> to vector<8x1xf32>
      %cst_31 = arith.constant 3.200000e+01 : f32
      %54 = vector.broadcast %cst_31 : f32 to vector<8x1xf32>
      %55 = arith.divf %53, %54 : vector<8x1xf32>
      %56 = vector.broadcast %55 : vector<8x1xf32> to vector<8x32xf32>
      %57 = arith.subf %arg24, %56 : vector<8x32xf32>
      %58 = arith.mulf %57, %57 : vector<8x32xf32>
      %cst_32 = arith.constant dense<0.000000e+00> : vector<8xf32>
      %59 = vector.multi_reduction <add>, %58, %cst_32 [1] : vector<8x32xf32> to vector<8xf32>
      %60 = vector.shape_cast %59 : vector<8xf32> to vector<8x1xf32>
      %cst_33 = arith.constant 3.200000e+01 : f32
      %61 = vector.broadcast %cst_33 : f32 to vector<8x1xf32>
      %62 = arith.divf %60, %61 : vector<8x1xf32>
      %63 = vector.broadcast %55 : vector<8x1xf32> to vector<8x32xf32>
      %64 = arith.subf %arg24, %63 : vector<8x32xf32>
      %cst_34 = arith.constant 9.99999997E-7 : f32
      %65 = vector.broadcast %cst_34 : f32 to vector<8x1xf32>
      %66 = arith.addf %62, %65 : vector<8x1xf32>
      %67 = math.rsqrt %66 : vector<8x1xf32>
      %68 = vector.broadcast %67 : vector<8x1xf32> to vector<8x32xf32>
      %69 = arith.mulf %64, %68 : vector<8x32xf32>
      %70 = vector.broadcast %48 : vector<1x32xf32> to vector<8x32xf32>
      %71 = arith.mulf %69, %70 : vector<8x32xf32>
      %72 = vector.broadcast %51 : vector<1x32xf32> to vector<8x32xf32>
      %73 = arith.addf %71, %72 : vector<8x32xf32>
      %74 = arith.truncf %73 : vector<8x32xf32> to vector<8x32xbf16>
      %75 = arith.index_cast %arg23 : i32 to index
      %c0_35 = arith.constant 0 : index
      %c0_36 = arith.constant 0 : index
      %76 = vector.load %arg8[%75, %c0_35, %c0_36] : memref<2x32x96xbf16, #tpu.memory_space<vmem>>, vector<1x32x96xbf16>
      %77 = vector.shape_cast %76 : vector<1x32x96xbf16> to vector<32x96xbf16>
      %cst_37 = arith.constant dense<0.000000e+00> : vector<8x96xf32>
      %78 = tpu.matmul %74, %77, %cst_37 {dimension_numbers = #tpu.dot_dimension_numbers<[1], [0], [0], [1], [0, 0, 1, 1], [], []>} : vector<8x32xbf16>, vector<32x96xbf16>, vector<8x96xf32> -> vector<8x96xf32>
      %79 = arith.index_cast %arg23 : i32 to index
      %c0_38 = arith.constant 0 : index
      %c0_39 = arith.constant 0 : index
      %80 = vector.load %arg9[%79, %c0_38, %c0_39] : memref<2x1x96xf32, #tpu.memory_space<vmem>>, vector<1x1x96xf32>
      %81 = vector.shape_cast %80 : vector<1x1x96xf32> to vector<1x96xf32>
      %82 = vector.broadcast %81 : vector<1x96xf32> to vector<8x96xf32>
      %83 = arith.addf %78, %82 : vector<8x96xf32>
      %84 = vector.extract_strided_slice %83 {offsets = [0, 0], sizes = [8, 32], strides = [1, 1]} : vector<8x96xf32> to vector<8x32xf32>
      %85 = vector.shape_cast %84 : vector<8x32xf32> to vector<8x2x16xf32>
      %86 = tpu.transpose %85, [1, 0, 2] : vector<8x2x16xf32> -> vector<2x8x16xf32>
      %87 = vector.extract_strided_slice %83 {offsets = [0, 32], sizes = [8, 32], strides = [1, 1]} : vector<8x96xf32> to vector<8x32xf32>
      %88 = vector.shape_cast %87 : vector<8x32xf32> to vector<8x2x16xf32>
      %89 = tpu.transpose %88, [1, 0, 2] : vector<8x2x16xf32> -> vector<2x8x16xf32>
      %90 = vector.extract_strided_slice %83 {offsets = [0, 64], sizes = [8, 32], strides = [1, 1]} : vector<8x96xf32> to vector<8x32xf32>
      %91 = vector.shape_cast %90 : vector<8x32xf32> to vector<8x2x16xf32>
      %92 = tpu.transpose %91, [1, 0, 2] : vector<8x2x16xf32> -> vector<2x8x16xf32>
      %93 = arith.truncf %86 : vector<2x8x16xf32> to vector<2x8x16xbf16>
      %94 = arith.truncf %89 : vector<2x8x16xf32> to vector<2x8x16xbf16>
      "tpu.trace_start"() <{level = 10 : i32, message = "hqd,hkd->hqk"}> : () -> ()
      %cst_40 = arith.constant dense<0.000000e+00> : vector<2x8x8xf32>
      %95 = tpu.matmul %93, %94, %cst_40 {dimension_numbers = #tpu.dot_dimension_numbers<[2], [2], [1], [1], [0, 0, 0, 1, 1, 1], [0], [0]>} : vector<2x8x16xbf16>, vector<2x8x16xbf16>, vector<2x8x8xf32> -> vector<2x8x8xf32>
      "tpu.trace_stop"() : () -> ()
      %96 = vector.broadcast %17 : vector<1x1x8xf32> to vector<2x8x8xf32>
      %97 = arith.addf %95, %96 : vector<2x8x8xf32>
      %cst_41 = arith.constant dense<0xFF800000> : vector<2x8xf32>
      %98 = vector.multi_reduction <maximumf>, %97, %cst_41 [2] : vector<2x8x8xf32> to vector<2x8xf32>
      %99 = vector.shape_cast %98 : vector<2x8xf32> to vector<2x8x1xf32>
      %100 = vector.broadcast %99 : vector<2x8x1xf32> to vector<2x8x8xf32>
      %101 = arith.subf %97, %100 : vector<2x8x8xf32>
      %102 = math.exp %101 : vector<2x8x8xf32>
      %cst_42 = arith.constant dense<0.000000e+00> : vector<2x8xf32>
      %103 = vector.multi_reduction <add>, %102, %cst_42 [2] : vector<2x8x8xf32> to vector<2x8xf32>
      %104 = vector.shape_cast %103 : vector<2x8xf32> to vector<2x8x1xf32>
      %105 = tpu.reciprocal %104 {approx = true} : vector<2x8x1xf32> -> vector<2x8x1xf32>
      %106 = vector.broadcast %105 : vector<2x8x1xf32> to vector<2x8x8xf32>
      %107 = arith.mulf %102, %106 : vector<2x8x8xf32>
      %108 = arith.truncf %107 : vector<2x8x8xf32> to vector<2x8x8xbf16>
      %109 = arith.truncf %92 : vector<2x8x16xf32> to vector<2x8x16xbf16>
      "tpu.trace_start"() <{level = 10 : i32, message = "hqk,hkd->hqd"}> : () -> ()
      %cst_43 = arith.constant dense<0.000000e+00> : vector<2x8x16xf32>
      %110 = tpu.matmul %108, %109, %cst_43 {dimension_numbers = #tpu.dot_dimension_numbers<[2], [1], [1], [2], [0, 0, 0, 1, 1, 2], [0], [0]>} : vector<2x8x8xbf16>, vector<2x8x16xbf16>, vector<2x8x16xf32> -> vector<2x8x16xf32>
      "tpu.trace_stop"() : () -> ()
      %111 = tpu.transpose %110, [1, 0, 2] : vector<2x8x16xf32> -> vector<8x2x16xf32>
      %112 = vector.shape_cast %111 : vector<8x2x16xf32> to vector<8x32xf32>
      %113 = arith.truncf %112 : vector<8x32xf32> to vector<8x32xbf16>
      %114 = arith.index_cast %arg23 : i32 to index
      %c0_44 = arith.constant 0 : index
      %c0_45 = arith.constant 0 : index
      %115 = vector.load %arg10[%114, %c0_44, %c0_45] : memref<2x32x32xbf16, #tpu.memory_space<vmem>>, vector<1x32x32xbf16>
      %116 = vector.shape_cast %115 : vector<1x32x32xbf16> to vector<32x32xbf16>
      %cst_46 = arith.constant dense<0.000000e+00> : vector<8x32xf32>
      %117 = tpu.matmul %113, %116, %cst_46 {dimension_numbers = #tpu.dot_dimension_numbers<[1], [0], [0], [1], [0, 0, 1, 1], [], []>} : vector<8x32xbf16>, vector<32x32xbf16>, vector<8x32xf32> -> vector<8x32xf32>
      %118 = arith.index_cast %arg23 : i32 to index
      %c0_47 = arith.constant 0 : index
      %c0_48 = arith.constant 0 : index
      %119 = vector.load %arg11[%118, %c0_47, %c0_48] : memref<2x1x32xf32, #tpu.memory_space<vmem>>, vector<1x1x32xf32>
      %120 = vector.shape_cast %119 : vector<1x1x32xf32> to vector<1x32xf32>
      %121 = vector.broadcast %120 : vector<1x32xf32> to vector<8x32xf32>
      %122 = arith.addf %117, %121 : vector<8x32xf32>
      %123 = arith.index_cast %arg23 : i32 to index
      %c0_49 = arith.constant 0 : index
      %c0_50 = arith.constant 0 : index
      %124 = vector.load %arg12[%123, %c0_49, %c0_50] : memref<2x1x32xf32, #tpu.memory_space<vmem>>, vector<1x1x32xf32>
      %125 = vector.shape_cast %124 : vector<1x1x32xf32> to vector<1x32xf32>
      %126 = vector.broadcast %125 : vector<1x32xf32> to vector<8x32xf32>
      %127 = arith.mulf %126, %122 : vector<8x32xf32>
      %128 = arith.addf %arg24, %127 : vector<8x32xf32>
      %129 = arith.index_cast %arg23 : i32 to index
      %c0_51 = arith.constant 0 : index
      %c0_52 = arith.constant 0 : index
      %130 = vector.load %arg13[%129, %c0_51, %c0_52] : memref<2x1x32xf32, #tpu.memory_space<vmem>>, vector<1x1x32xf32>
      %131 = vector.shape_cast %130 : vector<1x1x32xf32> to vector<1x32xf32>
      %132 = arith.index_cast %arg23 : i32 to index
      %c0_53 = arith.constant 0 : index
      %c0_54 = arith.constant 0 : index
      %133 = vector.load %arg14[%132, %c0_53, %c0_54] : memref<2x1x32xf32, #tpu.memory_space<vmem>>, vector<1x1x32xf32>
      %134 = vector.shape_cast %133 : vector<1x1x32xf32> to vector<1x32xf32>
      %cst_55 = arith.constant dense<0.000000e+00> : vector<8xf32>
      %135 = vector.multi_reduction <add>, %128, %cst_55 [1] : vector<8x32xf32> to vector<8xf32>
      %136 = vector.shape_cast %135 : vector<8xf32> to vector<8x1xf32>
      %cst_56 = arith.constant 3.200000e+01 : f32
      %137 = vector.broadcast %cst_56 : f32 to vector<8x1xf32>
      %138 = arith.divf %136, %137 : vector<8x1xf32>
      %139 = vector.broadcast %138 : vector<8x1xf32> to vector<8x32xf32>
      %140 = arith.subf %128, %139 : vector<8x32xf32>
      %141 = arith.mulf %140, %140 : vector<8x32xf32>
      %cst_57 = arith.constant dense<0.000000e+00> : vector<8xf32>
      %142 = vector.multi_reduction <add>, %141, %cst_57 [1] : vector<8x32xf32> to vector<8xf32>
      %143 = vector.shape_cast %142 : vector<8xf32> to vector<8x1xf32>
      %cst_58 = arith.constant 3.200000e+01 : f32
      %144 = vector.broadcast %cst_58 : f32 to vector<8x1xf32>
      %145 = arith.divf %143, %144 : vector<8x1xf32>
      %146 = vector.broadcast %138 : vector<8x1xf32> to vector<8x32xf32>
      %147 = arith.subf %128, %146 : vector<8x32xf32>
      %cst_59 = arith.constant 9.99999997E-7 : f32
      %148 = vector.broadcast %cst_59 : f32 to vector<8x1xf32>
      %149 = arith.addf %145, %148 : vector<8x1xf32>
      %150 = math.rsqrt %149 : vector<8x1xf32>
      %151 = vector.broadcast %150 : vector<8x1xf32> to vector<8x32xf32>
      %152 = arith.mulf %147, %151 : vector<8x32xf32>
      %153 = vector.broadcast %131 : vector<1x32xf32> to vector<8x32xf32>
      %154 = arith.mulf %152, %153 : vector<8x32xf32>
      %155 = vector.broadcast %134 : vector<1x32xf32> to vector<8x32xf32>
      %156 = arith.addf %154, %155 : vector<8x32xf32>
      %157 = arith.truncf %156 : vector<8x32xf32> to vector<8x32xbf16>
      %158 = arith.index_cast %arg23 : i32 to index
      %c0_60 = arith.constant 0 : index
      %c0_61 = arith.constant 0 : index
      %159 = vector.load %arg15[%158, %c0_60, %c0_61] : memref<2x32x128xbf16, #tpu.memory_space<vmem>>, vector<1x32x128xbf16>
      %160 = vector.shape_cast %159 : vector<1x32x128xbf16> to vector<32x128xbf16>
      %cst_62 = arith.constant dense<0.000000e+00> : vector<8x128xf32>
      %161 = tpu.matmul %157, %160, %cst_62 {dimension_numbers = #tpu.dot_dimension_numbers<[1], [0], [0], [1], [0, 0, 1, 1], [], []>} : vector<8x32xbf16>, vector<32x128xbf16>, vector<8x128xf32> -> vector<8x128xf32>
      %162 = arith.index_cast %arg23 : i32 to index
      %c0_63 = arith.constant 0 : index
      %c0_64 = arith.constant 0 : index
      %163 = vector.load %arg16[%162, %c0_63, %c0_64] : memref<2x1x128xf32, #tpu.memory_space<vmem>>, vector<1x1x128xf32>
      %164 = vector.shape_cast %163 : vector<1x1x128xf32> to vector<1x128xf32>
      %165 = vector.broadcast %164 : vector<1x128xf32> to vector<8x128xf32>
      %166 = arith.addf %161, %165 : vector<8x128xf32>
      %cst_65 = arith.constant 5.000000e-01 : f32
      %167 = vector.broadcast %cst_65 : f32 to vector<8x128xf32>
      %168 = arith.mulf %167, %166 : vector<8x128xf32>
      %cst_66 = arith.constant 0.707106769 : f32
      %169 = vector.broadcast %cst_66 : f32 to vector<8x128xf32>
      %170 = arith.mulf %166, %169 : vector<8x128xf32>
      %171 = math.erf %170 : vector<8x128xf32>
      %cst_67 = arith.constant 1.000000e+00 : f32
      %172 = vector.broadcast %cst_67 : f32 to vector<8x128xf32>
      %173 = arith.addf %172, %171 : vector<8x128xf32>
      %174 = arith.mulf %168, %173 : vector<8x128xf32>
      %175 = arith.truncf %174 : vector<8x128xf32> to vector<8x128xbf16>
      %176 = arith.index_cast %arg23 : i32 to index
      %c0_68 = arith.constant 0 : index
      %c0_69 = arith.constant 0 : index
      %177 = vector.load %arg17[%176, %c0_68, %c0_69] : memref<2x128x32xbf16, #tpu.memory_space<vmem>>, vector<1x128x32xbf16>
      %178 = vector.shape_cast %177 : vector<1x128x32xbf16> to vector<128x32xbf16>
      %cst_70 = arith.constant dense<0.000000e+00> : vector<8x32xf32>
      %179 = tpu.matmul %175, %178, %cst_70 {dimension_numbers = #tpu.dot_dimension_numbers<[1], [0], [0], [1], [0, 0, 1, 1], [], []>} : vector<8x128xbf16>, vector<128x32xbf16>, vector<8x32xf32> -> vector<8x32xf32>
      %180 = arith.index_cast %arg23 : i32 to index
      %c0_71 = arith.constant 0 : index
      %c0_72 = arith.constant 0 : index
      %181 = vector.load %arg18[%180, %c0_71, %c0_72] : memref<2x1x32xf32, #tpu.memory_space<vmem>>, vector<1x1x32xf32>
      %182 = vector.shape_cast %181 : vector<1x1x32xf32> to vector<1x32xf32>
      %183 = vector.broadcast %182 : vector<1x32xf32> to vector<8x32xf32>
      %184 = arith.addf %179, %183 : vector<8x32xf32>
      %185 = arith.index_cast %arg23 : i32 to index
      %c0_73 = arith.constant 0 : index
      %c0_74 = arith.constant 0 : index
      %186 = vector.load %arg19[%185, %c0_73, %c0_74] : memref<2x1x32xf32, #tpu.memory_space<vmem>>, vector<1x1x32xf32>
      %187 = vector.shape_cast %186 : vector<1x1x32xf32> to vector<1x32xf32>
      %188 = vector.broadcast %187 : vector<1x32xf32> to vector<8x32xf32>
      %189 = arith.mulf %188, %184 : vector<8x32xf32>
      %190 = arith.addf %128, %189 : vector<8x32xf32>
      scf.yield %190 : vector<8x32xf32>
    }
    %c2_i32_13 = arith.constant 2 : i32
    %20 = vector.extract_strided_slice %19 {offsets = [0, 0], sizes = [1, 32], strides = [1, 1]} : vector<8x32xf32> to vector<1x32xf32>
    %c0_14 = arith.constant 0 : index
    %c0_15 = arith.constant 0 : index
    %21 = vector.load %arg20[%c0_14, %c0_15] : memref<1x32xf32, #tpu.memory_space<vmem>>, vector<1x32xf32>
    %c0_16 = arith.constant 0 : index
    %c0_17 = arith.constant 0 : index
    %22 = vector.load %arg21[%c0_16, %c0_17] : memref<1x32xf32, #tpu.memory_space<vmem>>, vector<1x32xf32>
    %cst_18 = arith.constant dense<0.000000e+00> : vector<1xf32>
    %23 = vector.multi_reduction <add>, %20, %cst_18 [1] : vector<1x32xf32> to vector<1xf32>
    %24 = vector.shape_cast %23 : vector<1xf32> to vector<1x1xf32>
    %cst_19 = arith.constant 3.200000e+01 : f32
    %25 = vector.broadcast %cst_19 : f32 to vector<1x1xf32>
    %26 = arith.divf %24, %25 : vector<1x1xf32>
    %27 = vector.broadcast %26 : vector<1x1xf32> to vector<1x32xf32>
    %28 = arith.subf %20, %27 : vector<1x32xf32>
    %29 = arith.mulf %28, %28 : vector<1x32xf32>
    %cst_20 = arith.constant dense<0.000000e+00> : vector<1xf32>
    %30 = vector.multi_reduction <add>, %29, %cst_20 [1] : vector<1x32xf32> to vector<1xf32>
    %31 = vector.shape_cast %30 : vector<1xf32> to vector<1x1xf32>
    %cst_21 = arith.constant 3.200000e+01 : f32
    %32 = vector.broadcast %cst_21 : f32 to vector<1x1xf32>
    %33 = arith.divf %31, %32 : vector<1x1xf32>
    %34 = vector.broadcast %26 : vector<1x1xf32> to vector<1x32xf32>
    %35 = arith.subf %20, %34 : vector<1x32xf32>
    %cst_22 = arith.constant 9.99999997E-7 : f32
    %36 = vector.broadcast %cst_22 : f32 to vector<1x1xf32>
    %37 = arith.addf %33, %36 : vector<1x1xf32>
    %38 = math.rsqrt %37 : vector<1x1xf32>
    %39 = vector.broadcast %38 : vector<1x1xf32> to vector<1x32xf32>
    %40 = arith.mulf %35, %39 : vector<1x32xf32>
    %41 = arith.mulf %40, %21 : vector<1x32xf32>
    %42 = arith.addf %41, %22 : vector<1x32xf32>
    %c0_23 = arith.constant 0 : index
    %c0_24 = arith.constant 0 : index
    %c0_25 = arith.constant 0 : index
    %43 = vector.load %arg22[%c0_23, %c0_24, %c0_25] : memref<1x1x32xf32, #tpu.memory_space<vmem>>, vector<1x1x32xf32>
    %44 = vector.shape_cast %43 : vector<1x1x32xf32> to vector<1x32xf32>
    %45 = vector.shape_cast %42 : vector<1x32xf32> to vector<1x1x32xf32>
    tpu.vector_store %arg22[%c0_23, %c0_24, %c0_25], %45 {strides = array<i32>} : memref<1x1x32xf32, #tpu.memory_space<vmem>>, vector<1x1x32xf32>,
    return
  }
  func.func @transform_0(%arg0: i32) -> (i32, i32, i32) {
    %c0_i32 = arith.constant 0 : i32
    %c0_i32_0 = arith.constant 0 : i32
    %c0_i32_1 = arith.constant 0 : i32
    return %arg0, %c0_i32, %c0_i32_0 : i32, i32, i32
  }
  func.func @transform_1(%arg0: i32) -> (i32, i32) {
    %c0_i32 = arith.constant 0 : i32
    %c0_i32_0 = arith.constant 0 : i32
    %c0_i32_1 = arith.constant 0 : i32
    return %c0_i32, %c0_i32_0 : i32, i32
  }
  func.func @transform_2(%arg0: i32) -> (i32, i32) {
    %c0_i32 = arith.constant 0 : i32
    %c0_i32_0 = arith.constant 0 : i32
    %c0_i32_1 = arith.constant 0 : i32
    return %c0_i32, %c0_i32_0 : i32, i32
  }
  func.func @transform_3(%arg0: i32) -> (i32, i32) {
    %c0_i32 = arith.constant 0 : i32
    %c0_i32_0 = arith.constant 0 : i32
    %c0_i32_1 = arith.constant 0 : i32
    return %c0_i32, %c0_i32_0 : i32, i32
  }
  func.func @transform_4(%arg0: i32) -> (i32, i32) {
    %c0_i32 = arith.constant 0 : i32
    %c0_i32_0 = arith.constant 0 : i32
    %c0_i32_1 = arith.constant 0 : i32
    return %c0_i32, %c0_i32_0 : i32, i32
  }
  func.func @transform_5(%arg0: i32) -> (i32, i32, i32) {
    %c0_i32 = arith.constant 0 : i32
    %c0_i32_0 = arith.constant 0 : i32
    %c0_i32_1 = arith.constant 0 : i32
    %c0_i32_2 = arith.constant 0 : i32
    return %c0_i32, %c0_i32_0, %c0_i32_1 : i32, i32, i32
  }
  func.func @transform_6(%arg0: i32) -> (i32, i32, i32) {
    %c0_i32 = arith.constant 0 : i32
    %c0_i32_0 = arith.constant 0 : i32
    %c0_i32_1 = arith.constant 0 : i32
    %c0_i32_2 = arith.constant 0 : i32
    return %c0_i32, %c0_i32_0, %c0_i32_1 : i32, i32, i32
  }
  func.func @transform_7(%arg0: i32) -> (i32, i32, i32) {
    %c0_i32 = arith.constant 0 : i32
    %c0_i32_0 = arith.constant 0 : i32
    %c0_i32_1 = arith.constant 0 : i32
    %c0_i32_2 = arith.constant 0 : i32
    return %c0_i32, %c0_i32_0, %c0_i32_1 : i32, i32, i32
  }
  func.func @transform_8(%arg0: i32) -> (i32, i32, i32) {
    %c0_i32 = arith.constant 0 : i32
    %c0_i32_0 = arith.constant 0 : i32
    %c0_i32_1 = arith.constant 0 : i32
    %c0_i32_2 = arith.constant 0 : i32
    return %c0_i32, %c0_i32_0, %c0_i32_1 : i32, i32, i32
  }
  func.func @transform_9(%arg0: i32) -> (i32, i32, i32) {
    %c0_i32 = arith.constant 0 : i32
    %c0_i32_0 = arith.constant 0 : i32
    %c0_i32_1 = arith.constant 0 : i32
    %c0_i32_2 = arith.constant 0 : i32
    return %c0_i32, %c0_i32_0, %c0_i32_1 : i32, i32, i32
  }
  func.func @transform_10(%arg0: i32) -> (i32, i32, i32) {
    %c0_i32 = arith.constant 0 : i32
    %c0_i32_0 = arith.constant 0 : i32
    %c0_i32_1 = arith.constant 0 : i32
    %c0_i32_2 = arith.constant 0 : i32
    return %c0_i32, %c0_i32_0, %c0_i32_1 : i32, i32, i32
  }
  func.func @transform_11(%arg0: i32) -> (i32, i32, i32) {
    %c0_i32 = arith.constant 0 : i32
    %c0_i32_0 = arith.constant 0 : i32
    %c0_i32_1 = arith.constant 0 : i32
    %c0_i32_2 = arith.constant 0 : i32
    return %c0_i32, %c0_i32_0, %c0_i32_1 : i32, i32, i32
  }
  func.func @transform_12(%arg0: i32) -> (i32, i32, i32) {
    %c0_i32 = arith.constant 0 : i32
    %c0_i32_0 = arith.constant 0 : i32
    %c0_i32_1 = arith.constant 0 : i32
    %c0_i32_2 = arith.constant 0 : i32
    return %c0_i32, %c0_i32_0, %c0_i32_1 : i32, i32, i32
  }
  func.func @transform_13(%arg0: i32) -> (i32, i32, i32) {
    %c0_i32 = arith.constant 0 : i32
    %c0_i32_0 = arith.constant 0 : i32
    %c0_i32_1 = arith.constant 0 : i32
    %c0_i32_2 = arith.constant 0 : i32
    return %c0_i32, %c0_i32_0, %c0_i32_1 : i32, i32, i32
  }
  func.func @transform_14(%arg0: i32) -> (i32, i32, i32) {
    %c0_i32 = arith.constant 0 : i32
    %c0_i32_0 = arith.constant 0 : i32
    %c0_i32_1 = arith.constant 0 : i32
    %c0_i32_2 = arith.constant 0 : i32
    return %c0_i32, %c0_i32_0, %c0_i32_1 : i32, i32, i32
  }
  func.func @transform_15(%arg0: i32) -> (i32, i32, i32) {
    %c0_i32 = arith.constant 0 : i32
    %c0_i32_0 = arith.constant 0 : i32
    %c0_i32_1 = arith.constant 0 : i32
    %c0_i32_2 = arith.constant 0 : i32
    return %c0_i32, %c0_i32_0, %c0_i32_1 : i32, i32, i32
  }
  func.func @transform_16(%arg0: i32) -> (i32, i32, i32) {
    %c0_i32 = arith.constant 0 : i32
    %c0_i32_0 = arith.constant 0 : i32
    %c0_i32_1 = arith.constant 0 : i32
    %c0_i32_2 = arith.constant 0 : i32
    return %c0_i32, %c0_i32_0, %c0_i32_1 : i32, i32, i32
  }
  func.func @transform_17(%arg0: i32) -> (i32, i32, i32) {
    %c0_i32 = arith.constant 0 : i32
    %c0_i32_0 = arith.constant 0 : i32
    %c0_i32_1 = arith.constant 0 : i32
    %c0_i32_2 = arith.constant 0 : i32
    return %c0_i32, %c0_i32_0, %c0_i32_1 : i32, i32, i32
  }
  func.func @transform_18(%arg0: i32) -> (i32, i32, i32) {
    %c0_i32 = arith.constant 0 : i32
    %c0_i32_0 = arith.constant 0 : i32
    %c0_i32_1 = arith.constant 0 : i32
    %c0_i32_2 = arith.constant 0 : i32
    return %c0_i32, %c0_i32_0, %c0_i32_1 : i32, i32, i32
  }
  func.func @transform_19(%arg0: i32) -> (i32, i32) {
    %c0_i32 = arith.constant 0 : i32
    %c0_i32_0 = arith.constant 0 : i32
    %c0_i32_1 = arith.constant 0 : i32
    return %c0_i32, %c0_i32_0 : i32, i32
  }
  func.func @transform_20(%arg0: i32) -> (i32, i32) {
    %c0_i32 = arith.constant 0 : i32
    %c0_i32_0 = arith.constant 0 : i32
    %c0_i32_1 = arith.constant 0 : i32
    return %c0_i32, %c0_i32_0 : i32, i32
  }
  func.func @transform_21(%arg0: i32) -> (i32, i32, i32) {
    %c0_i32 = arith.constant 0 : i32
    %c0_i32_0 = arith.constant 0 : i32
    %c0_i32_1 = arith.constant 0 : i32
    return %arg0, %c0_i32, %c0_i32_0 : i32, i32, i32
  }
}

</mosaic_0001>

<bundles_post_ra>
// kernel: dinov2_forward.1
= control target key start
LH: loop header
LB: loop body
LE: loop exit
PB: predicated region body
PF: predicated region fallthrough
CT: control target
= control target key end

     0   :  { %s3482_s0 = inlined_call_operand.vmem [shape: bf16[2,4,640], index: 0, kind: input, shape index: {}]   ;;  %s3483_s1 = inlined_call_operand.vmem [shape: bf16[640,32], index: 1, kind: input, shape index: {}]   ;;  %s3484_s2 = inlined_call_operand.vmem [shape: f32[1,32], index: 2, kind: input, shape index: {}]   ;;  %s3485_s3 = inlined_call_operand.vmem [shape: f32[1,32], index: 3, kind: input, shape index: {}]   ;;  %s3486_s4 = inlined_call_operand.vmem [shape: f32[4,32], index: 4, kind: input, shape index: {}]   ;;  %s3487_s5 = inlined_call_operand.vmem [shape: f32[2,1,32], index: 5, kind: input, shape index: {}]   ;;  %s3488_s6 = inlined_call_operand.vmem [shape: f32[2,1,32], index: 6, kind: input, shape index: {}]   ;;  %s3489_s7 = inlined_call_operand.vmem [shape: bf16[2,32,96], index: 7, kind: input, shape index: {}]   ;;  %s3490_s8 = inlined_call_operand.vmem [shape: f32[2,1,96], index: 8, kind: input, shape index: {}]   ;;  %s3491_s9 = inlined_call_operand.vmem [shape: bf16[2,32,32], index: 9, kind: input, shape index: {}]   ;;  %s3492_s10 = inlined_call_operand.vmem [shape: f32[2,1,32], index: 10, kind: input, shape index: {}]   ;;  %s3493_s11 = inlined_call_operand.vmem [shape: f32[2,1,32], index: 11, kind: input, shape index: {}]   ;;  %s3494_s12 = inlined_call_operand.vmem [shape: f32[2,1,32], index: 12, kind: input, shape index: {}]   ;;  %s3495_s13 = inlined_call_operand.vmem [shape: f32[2,1,32], index: 13, kind: input, shape index: {}]   ;;  %s3496_s14 = inlined_call_operand.vmem [shape: bf16[2,32,128], index: 14, kind: input, shape index: {}]   ;;  %s3497_s15 = inlined_call_operand.vmem [shape: f32[2,1,128], index: 15, kind: input, shape index: {}]   ;;  %s3498_s16 = inlined_call_operand.vmem [shape: bf16[2,128,32], index: 16, kind: input, shape index: {}]   ;;  %s3499_s17 = inlined_call_operand.vmem [shape: f32[2,1,32], index: 17, kind: input, shape index: {}]   ;;  %s3500_s18 = inlined_call_operand.vmem [shape: f32[2,1,32], index: 18, kind: input, shape index: {}]   ;;  %s3501_s19 = inlined_call_operand.vmem [shape: f32[1,32], index: 19, kind: input, shape index: {}]   ;;  %s3502_s20 = inlined_call_operand.vmem [shape: f32[1,32], index: 20, kind: input, shape index: {}]   ;;  %s3503_s21 = inlined_call_operand.hbm [shape: f32[2,1,32], index: 21, kind: output, shape index: {}]  }
   0x1   :  { %3513 = sst [smem:[#allocation11_spill]] %s3482_s0 }
   0x2   :  { %3514 = sst [smem:[#allocation12_spill]] %s3483_s1 }
   0x3   :  { %3515 = sst [smem:[#allocation13_spill]] %s3484_s2 }
   0x4   :  { %3516 = sst [smem:[#allocation14_spill]] %s3485_s3 }
   0x5   :  { %3517 = sst [smem:[#allocation15_spill]] %s3486_s4 }
   0x6   :  { %3518 = sst [smem:[#allocation16_spill]] %s3487_s5 }
   0x7   :  { %3519 = sst [smem:[#allocation17_spill]] %s3489_s7 }
   0x8   :  { %3520 = sst [smem:[#allocation18_spill]] %s3503_s21 }
   0x9   :  { %26 = vsyncpa [#allocation3], 0 }
   0xa   :  { %28 = vsyncpa [#allocation3 + $0x1], 0  ;;  %s2994_s2 = smov 0   ;;  %s2996_s25 = smov 0  }
   0xb   :  { %s2998_s26 = smov 0   ;;  %s3000_s27 = smov 0  }
   0xc LB: > { %3521 = sst [smem:[#allocation5_spill]] %s2850_s2  ;;  %s3015_s3 = sadd.s32 4294967295, %s2862_s27   ;;  %s2862_s27 = sphi %s3000_s27, %s3543_s27   ;;  %s2858_s26 = sphi %s2998_s26, %s3545_s26   ;;  %s2854_s25 = sphi %s2996_s25, %s3547_s25   ;;  %s2850_s2 = sphi %s2994_s2, %s3546_s2  }
   0xd   : > { %3522 = sst [smem:[#allocation6_spill]] %s2858_s26  ;;  %s2388_s28 = sadd.s32 4294967294, %s2862_s27  }
   0xe   : > { %3523 = sst [smem:[#allocation7_spill]] %s2862_s27  ;;  %s3019_s29 = sadd.s32 1, %s2862_s27  }
   0xf   : > { %3524 = sst [smem:[#allocation8_spill]] %s3019_s29  ;;  %s487_s0 = sadd.s32 1, %s2858_s26 }
  0x10   : > { %s484_s4 = ssub.s32 %s2862_s27, %s3019_s29  ;;  %p497_p0 = scmp.ne.s32.totalorder %s2858_s26, %s2854_s25 }
  0x11   : > { %p485_p1 = scmp.eq.s32.totalorder %s484_s4, 0  ;;  %p498_p2 = scmp.eq.s32.totalorder %s3015_s3, 1 }
  0x12   : > { %p503_p3 = scmp.ne.s32.totalorder %s2854_s25, %s2850_s2  ;;  %p504_p4 = scmp.eq.s32.totalorder %s2388_s28, 1 }
  0x13   : > { %s3030_s30 = scalar_select %p485_p1, %s2858_s26, %s487_s0  }
  0x14   : > { %p3032_p5 = por %p498_p2, %p497_p0  ;;  %p3036_p6 = por %p504_p4, %p503_p3 }
  0x15   : > { %3525 = sst [smem:[#allocation9_spill]] %s3030_s30  ;;  %p2391_p7 = scmp.ge.s32.totalorder %s2862_s27, 1 }
  0x16   : > { %s3527_s22 = scalar_select %p3036_p6, 1, 0 }
  0x17   : > { %p590_p8 = scmp.lt.s32.totalorder %s2862_s27, 3 }
  0x18   : > { %3528 = sst [smem:[#allocation10_spill]] %s3527_s22 }
  0x19   : > { %p591_p9 = pnand %p2391_p7, %p590_p8 }
  0x1a   : > { %s3529_s4 = sld [smem:[#allocation12_spill]] (!%p591_p9)  ;;  %p649_p10 = scmp.lt.s32.totalorder (!%p591_p9), %s3015_s3, 1  ;;  %v750_v22 = vlaneseq (!%p591_p9)  ;;  %v2872_v35 = vmov (!%p591_p9), 1983009808   ;;  %v2873_v38 = vmov (!%p591_p9), -1e+30  }
  0x1b   : > { %594 = sbr.rel (%p591_p9) target bundleno = 3315 (0xcf3), region = 104  ;;  %s3530_s21 = sld [smem:[#allocation11_spill]] (!%p591_p9)  ;;  %v748_v36 = vunpack.c.l.s4 (!%p591_p9), %v2872_v35  ;;  %v2874_v40 = vmov (!%p591_p9), 0.0   ;;  %vm2875_vm1 = vmmov (!%p591_p9), 0   ;;  %vm1141_vm2 = vcmask (!%p591_p9), 1040384  }
  0x1c   : > { %v1146_v25 = vand.u32 (!%p591_p9), 127, %v750_v22  ;;  %v3147_v37 = vshrl.u32 (!%p591_p9), %v750_v22, 7  ;;  %s3531_s29 = sld [smem:[#allocation13_spill]] (!%p591_p9)  ;;  %s3532_s27 = sld [smem:[#allocation15_spill]] (!%p591_p9)  ;;  %vm1143_vm3 = vcmask (!%p591_p9), 1044480  }
  0x1d   : > { %v749_v41 = vunpack.c.0.s8 (!%p591_p9), %v748_v36  ;;  %s3534_s23 = sand.u32 (!%p591_p9), 1, %s2854_s25   ;;  %s3196_s1 = smov (!%p591_p9), 0  }
  0x1e   : > { %vm1147_vm0 = vcmp.lt.s32.totalorder (!%p591_p9), %v1146_v25, 5 }
  0x1f   : > { %v3149_v39 = vsel (!%p591_p9), %vm1147_vm0, 0.0, %v2873_v38  ;;  %v3152_v43 = vsub.s32 (!%p591_p9), %v749_v41, %v3147_v37 }
  0x20   : > { %v2721_v0 = vld [vmem:[%s3529_s4 + $0x40] sm:$0xff] (!%p591_p9)   ;;  %v2725_v4 = vld [vmem:[%s3529_s4 + $0x48] sm:$0xff] (!%p591_p9)   ;;  %v2729_v8 = vld [vmem:[%s3529_s4 + $0x50] sm:$0xff] (!%p591_p9)  }
  0x21   : > { %v2722_v1 = vld [vmem:[%s3529_s4] sm:$0xff] (!%p591_p9)   ;;  %2487 = vmatprep.subr.bf16.mxu0 (!%p591_p9), %v2721_v0  ;;  %v2726_v5 = vld [vmem:[%s3529_s4 + $0x8] sm:$0xff] (!%p591_p9)   ;;  %v2730_v9 = vld [vmem:[%s3529_s4 + $0x10] sm:$0xff] (!%p591_p9)  }
  0x22   : > { %v2723_v2 = vld [vmem:[%s3529_s4 + $0xc0] sm:$0xff]   ;;  %2488 = vmatpush3.bf16.msra.mxu0 %v2722_v1  ;;  %v2727_v6 = vld [vmem:[%s3529_s4 + $0xc8] sm:$0xff]   ;;  %v2731_v10 = vld [vmem:[%s3529_s4 + $0xd0] sm:$0xff]   ;;  %s650_s28 = scalar_select %p649_p10, %s3015_s3, 1 }
  0x23   : > { %v2724_v3 = vld [vmem:[%s3529_s4 + $0x80] sm:$0xff]   ;;  %2509 = vmatprep.subr.bf16.mxu1 %v2723_v2  ;;  %2489 = vmatprep.subr.bf16.mxu0 %v2725_v4  ;;  %v2728_v7 = vld [vmem:[%s3529_s4 + $0x88] sm:$0xff]   ;;  %v2732_v11 = vld [vmem:[%s3529_s4 + $0x90] sm:$0xff]  }
  0x24   : > { %2510 = vmatpush3.bf16.msra.mxu1 %v2724_v3  ;;  %v2733_v12 = vld [vmem:[%s3529_s4 + $0x58] sm:$0xff]   ;;  %v2737_v16 = vld [vmem:[%s3529_s4 + $0x60] sm:$0xff]   ;;  %v2741_v20 = vld [vmem:[%s3529_s4 + $0x68] sm:$0xff]   ;;  %s2654_s24 = smul.u32 10, %s650_s28  ;;  %s3192_s28 = scalar_lea.vmem [#allocation2], %s3534_s23 }
  0x25   : > { %2511 = vmatprep.subr.bf16.mxu1 %v2727_v6  ;;  %v2734_v13 = vld [vmem:[%s3529_s4 + $0x18] sm:$0xff]   ;;  %v2738_v17 = vld [vmem:[%s3529_s4 + $0x20] sm:$0xff]   ;;  %v2742_v21 = vld [vmem:[%s3529_s4 + $0x28] sm:$0xff]  }
  0x26   : > { %2490 = vmatpush3.bf16.msra.mxu0 %v2726_v5  ;;  %v2735_v14 = vld [vmem:[%s3529_s4 + $0xd8] sm:$0xff]   ;;  %v2739_v18 = vld [vmem:[%s3529_s4 + $0xe0] sm:$0xff]   ;;  %v2743_v23 = vld [vmem:[%s3529_s4 + $0xe8] sm:$0xff]   ;;  %s3135_s0 = scalar_lea.vmem %s3530_s21, %s2654_s24  ;;  %s3533_s24 = sld [smem:[#allocation14_spill]] }
  0x27   : > { %2491 = vmatprep.subr.bf16.mxu0 %v2729_v8  ;;  %v2736_v15 = vld [vmem:[%s3529_s4 + $0x98] sm:$0xff]   ;;  %v2740_v19 = vld [vmem:[%s3529_s4 + $0xa0] sm:$0xff]   ;;  %v2744_v24 = vld [vmem:[%s3529_s4 + $0xa8] sm:$0xff]  }
  0x28   : > { %2512 = vmatpush3.bf16.msra.mxu1 %v2728_v7  ;;  %v2745_v26 = vld [vmem:[%s3529_s4 + $0x70] sm:$0xff]   ;;  %v2749_v30 = vld [vmem:[%s3529_s4 + $0x78] sm:$0xff]   ;;  %v655_v33 = vld [vmem:[%s3135_s0] sm:$0xff] }
  0x29   : > { %2513 = vmatprep.subr.bf16.mxu1 %v2731_v10  ;;  %v2746_v27 = vld [vmem:[%s3529_s4 + $0x30] sm:$0xff]   ;;  %v2750_v31 = vld [vmem:[%s3529_s4 + $0x38] sm:$0xff]   ;;  %v746_v42 = vcombine.high %v655_v33, %v655_v33  ;;  %v753_v44 = vrot.slane %v655_v33, %v3152_v43  ;;  %v2754_v48 = vld [vmem:[%s3529_s4 + $0x100] sm:$0xff]  }
  0x2a   : > { %2492 = vmatpush3.bf16.msra.mxu0 %v2730_v9  ;;  %v2747_v28 = vld [vmem:[%s3529_s4 + $0xf0] sm:$0xff]   ;;  %v2751_v32 = vld [vmem:[%s3529_s4 + $0xf8] sm:$0xff]   ;;  %v2755_v49 = vld [vmem:[%s3529_s4 + $0x108] sm:$0xff]  }
  0x2b   : > { %2493 = vmatprep.subr.bf16.mxu0 %v2733_v12  ;;  %v2748_v29 = vld [vmem:[%s3529_s4 + $0xb0] sm:$0xff]   ;;  %v2752_v34 = vld [vmem:[%s3529_s4 + $0xb8] sm:$0xff]   ;;  %v760_v45 = vrot.slane %v746_v42, %v3152_v43  ;;  %v761_v46 = vcombine.high %v753_v44, %v753_v44  ;;  %v2758_v52 = vld [vmem:[%s3529_s4 + $0x120] sm:$0xff]  }
  0x2c   : > { %2514 = vmatpush3.bf16.msra.mxu1 %v2732_v11  ;;  %v2756_v50 = vld [vmem:[%s3529_s4 + $0x110] sm:$0xff]   ;;  %v2757_v51 = vld [vmem:[%s3529_s4 + $0x118] sm:$0xff]   ;;  %v2759_v53 = vld [vmem:[%s3529_s4 + $0x128] sm:$0xff]  }
  0x2d   : > { %2515 = vmatprep.subr.bf16.mxu1 %v2735_v14  ;;  %v762_v47 = vcombine.high %v760_v45, %v760_v45  ;;  %1047 = vmatprep.mubr.bf16.mxu0 %v761_v46  ;;  %v2760_v54 = vld [vmem:[%s3529_s4 + $0x130] sm:$0xff]   ;;  %v2761_v55 = vld [vmem:[%s3529_s4 + $0x138] sm:$0xff]   ;;  %v2394_v56 = vld.sshfl [vmem:[%s3135_s0 + $0x8] sm:$0x3 pattern:$0x76325410] }
  0x2e   : > { %2494 = vmatpush3.bf16.msra.mxu0 %v2734_v13  ;;  %v2393_v59 = vld [vmem:[%s3531_s29] ss:$0 sm:$0xff] }
  0x2f   : > { %2495 = vmatprep.subr.bf16.mxu0 %v2737_v16  ;;  %1087 = vmatprep.mubr.bf16.mxu1 %v762_v47  ;;  %v1136_v7 = vld [vmem:[%s3532_s27] sm:$0xf] }
  0x30   : > { %2516 = vmatpush3.bf16.msra.mxu1 %v2736_v15  ;;  %v1135_v13 = vld [vmem:[%s3533_s24] sm:$0x1] }
  0x31   : > { %2517 = vmatprep.subr.bf16.mxu1 %v2739_v18 }
  0x32   : > { %2496 = vmatpush3.bf16.msra.mxu0 %v2738_v17 }
  0x33   : > { %2497 = vmatprep.subr.bf16.mxu0 %v2741_v20 }
  0x34   : > { %2518 = vmatpush3.bf16.msra.mxu1 %v2740_v19 }
  0x35   : > { %2519 = vmatprep.subr.bf16.mxu1 %v2743_v23 }
  0x36   : > { %2498 = vmatpush3.bf16.msra.mxu0 %v2742_v21 }
  0x37   : > { %2499 = vmatprep.subr.bf16.mxu0 %v2745_v26 }
  0x38   : > { %2520 = vmatpush3.bf16.msra.mxu1 %v2744_v24 }
  0x39   : > { %2521 = vmatprep.subr.bf16.mxu1 %v2747_v28 }
  0x3a   : > { %2500 = vmatpush3.bf16.msra.mxu0 %v2746_v27 }
  0x3b   : > { %2501 = vmatprep.subr.bf16.mxu0 %v2749_v30 }
  0x3c   : > { %2522 = vmatpush3.bf16.msra.mxu1 %v2748_v29 }
  0x3d   : > { %2523 = vmatprep.subr.bf16.mxu1 %v2751_v32 }
  0x3e   : > { %2502 = vmatpush3.bf16.msra.mxu0 %v2750_v31 }
  0x3f   : > { %2566 = vmatprep.subr.bf16.mxu0 %v2874_v40 }
  0x40   : > { %2524 = vmatpush3.bf16.msra.mxu1 %v2752_v34 }
  0x41   : > { %1048 = vmatmul.mubr.bf16.vlgmr.msra.gmra.mrb[0].mxu0 %v753_v44 }
  0x42   : > { %2567 = vmatpush3.bf16.msra.mxu0 %v2754_v48  ;;  %2582 = vmatprep.mubr.msk.bf16.mxu0 %vm2875_vm1, %v2874_v40 }
  0x43   : > { %1088 = vmatmul.mubr.bf16.vlgmr.msra.gmra.mrb[0].mxu1 %v760_v45  ;;  %2568 = vmatprep.subr.bf16.mxu0 %v2874_v40 }
  0x46   : > { %2569 = vmatpush3.bf16.msra.mxu0 %v2755_v49 }
  0x47   : > { %2570 = vmatprep.subr.bf16.mxu0 %v2874_v40 }
  0x4a   : > { %2571 = vmatpush3.bf16.msra.mxu0 %v2756_v50 }
  0x4b   : > { %2572 = vmatprep.subr.bf16.mxu0 %v2874_v40 }
  0x4e   : > { %2573 = vmatpush3.bf16.msra.mxu0 %v2757_v51 }
  0x4f   : > { %2574 = vmatprep.subr.bf16.mxu0 %v2874_v40 }
  0x52   : > { %2575 = vmatpush3.bf16.msra.mxu0 %v2758_v52 }
  0x53   : > { %2576 = vmatprep.subr.bf16.mxu0 %v2874_v40 }
  0x56   : > { %2577 = vmatpush3.bf16.msra.mxu0 %v2759_v53 }
  0x57   : > { %2578 = vmatprep.subr.bf16.mxu0 %v2874_v40 }
  0x5a   : > { %2579 = vmatpush3.bf16.msra.mxu0 %v2760_v54 }
  0x5b   : > { %2580 = vmatprep.subr.bf16.mxu0 %v2874_v40 }
  0x5e   : > { %2581 = vmatpush3.bf16.msra.mxu0 %v2761_v55 }
  0x61   : > { %2583 = vmatmul.mubr.bf16.vlgmr.msra.gmra.mrb[4].mxu0 %v2394_v56 }
 0x114   : > { %v2503_v57 = vpop.f32.mrb[0].mxu0 }
 0x115   : > { %v2504_v60 = vpop.f32.mrb[1].mxu0 }
 0x116   : > { %v2525_v58 = vpop.f32.mrb[0].mxu1  ;;  %v2505_v62 = vadd.f32 %v2504_v60, %v2503_v57  ;;  %v2506_v63 = vpop.f32.mrb[2].mxu0 }
 0x117   : > { %v2526_v61 = vpop.f32.mrb[1].mxu1  ;;  %v2507_v2 = vpop.f32.mrb[3].mxu0 }
 0x118   : > { %v2527_v0 = vadd.f32 %v2526_v61, %v2525_v58  ;;  %v2528_v1 = vpop.f32.mrb[2].mxu1  ;;  %v1050_v4 = vadd.f32 %v2505_v62, %v2393_v59 }
 0x119   : > { %v2529_v3 = vpop.f32.mrb[3].mxu1 }
 0x11a   : > { %v1090_v5 = vadd.f32 %v2527_v0, %v1050_v4 }
 0x134   : > { %v1129_v6 = vpop.f32.mrb[4].mxu0 }
 0x135   : > { %v1130_v8 = vadd.f32 %v1129_v6, %v1090_v5  ;;  %v2584_v9 = vpop.f32.mrb[5].mxu0 }
 0x136   : > { %v1132_v10 = vpop.f32.mrb[6].mxu0 }
 0x137   : > { %v1137_v11 = vadd.f32 %v1136_v7, %v1130_v8  ;;  %v2585_v12 = vpop.f32.mrb[7].mxu0 }
 0x139   : > { %v1139_v14 = vrot.slane %v1137_v11, 7 }
 0x13b   : > { %v1142_v15 = vsel %vm1141_vm2, %v1135_v13, %v1139_v14 }
 0x13c   : > { %v1144_v16 = vsel %vm1143_vm3, %v1142_v15, 0.0  }
 0x13d LB: >> { %vm1160_vm4 = vcmask 261120   ;;  %v2876_v23 = vmov 0.0   ;;  %vm2877_vm5 = vmmov 0   ;;  %s2483_s26 = sshll.u32 %s2870_s1, 4  ;;  %s3535_s7 = sld [smem:[#allocation17_spill]]  ;;  %vm1628_vm6 = vcmask 130048   ;;  %s2870_s1 = sphi %s3196_s1, %s1154_s1   ;;  %v2866_v16 = vphi %v1144_v16, %v3537_v16  }
 0x13e   : >> { %v1161_v17 = vsel %vm1160_vm4, %v2866_v16, 0.0  ;;  %2586 = vmatprep.subr.bf16.mxu0 %v2876_v23  ;;  %2590 = vmatprep.mubr.msk.bf16.mxu0 %vm2877_vm5, %v2876_v23  ;;  %s3221_s2 = scalar_lea.vmem %s3491_s9, %s2483_s26  ;;  %s3226_s23 = scalar_lea.vmem %s3496_s14, %s2483_s26  ;;  %v2880_v47 = vmov 1934713408   ;;  %vm1721_vm7 = vcmask 64512   ;;  %vm1751_vm8 = vcmask 1043456  }
 0x13f   : >> { %1162 = vadd.xlane.f32.xlu0 %v1161_v17  ;;  %2606 = vmatprep.subr.bf16.mxu1 %v2876_v23  ;;  %s3536_s22 = sld [smem:[#allocation16_spill]]  ;;  %s1197_s24 = scalar_lea.vmem %s3490_s8, %s2870_s1  ;;  %v1297_v48 = vunpack.c.l.s4 %v2880_v47 }
 0x140   : >> { %2608 = vmatprep.mubr.msk.bf16.mxu1 %vm2877_vm5, %v2876_v23  ;;  %v2439_v36 = vld [vmem:[%s1197_s24] ss:$0 sm:$0xff]  ;;  %s2879_s4 = smov 96   ;;  %s2881_s30 = smov 64  }
 0x141   : >> { %v1298_v51 = vunpack.c.0.s8 %v1297_v48  ;;  %s2032_s21 = scalar_lea.vmem %s3493_s11, %s2870_s1  ;;  %s2486_s24 = sshll.u32 %s2870_s1, 6 }
 0x142   : >> { %s2042_s29 = scalar_lea.vmem %s3494_s12, %s2870_s1 }
 0x143   : >> { %s1192_s0 = scalar_lea.vmem %s3535_s7, %s2483_s26  ;;  %s1158_s26 = scalar_lea.vmem %s3488_s6, %s2870_s1  ;;  %v3264_v59 = vsub.s32 %v1298_v51, %v3147_v37 }
 0x144   : >> { %v2762_v24 = vld [vmem:[%s1192_s0] sm:$0xff]   ;;  %v2763_v25 = vld [vmem:[%s1192_s0 + $0x8] sm:$0xff]   ;;  %s2878_s7 = smov 112  }
 0x145   : >> { %2587 = vmatpush3.bf16.msra.mxu0 %v2762_v24  ;;  %s1156_s27 = scalar_lea.vmem %s3536_s22, %s2870_s1  ;;  %v2436_v32 = vld [vmem:[%s1158_s26] ss:$0 sm:$0xff]  ;;  %s2044_s26 = scalar_lea.vmem %s3495_s13, %s2870_s1 }
 0x146   : >> { %2588 = vmatprep.subr.bf16.mxu0 %v2876_v23  ;;  %v2435_v30 = vld [vmem:[%s1156_s27] ss:$0 sm:$0xff]  ;;  %s1969_s27 = scalar_lea.vmem %s3492_s10, %s2870_s1 }
 0x149   : >> { %2589 = vmatpush3.bf16.msra.mxu0 %v2763_v25 }
 0x14a   : >> { %2594 = vmatprep.subr.bf16.mxu0 %v2876_v23 }
 0x1cc   : >> { %v1163_v18 = vpop.xlane.xlu0 %1162 }
 0x1cd   : >> { %v1165_v19 = vmul.f32 0.03125, %v1163_v18 }
 0x1cf   : >> { %v1166_v20 = vsub.f32 %v2866_v16, %v1165_v19 }
 0x1d1   : >> { %v1167_v21 = vmul.f32 %v1166_v20, %v1166_v20 }
 0x1d3   : >> { %v1168_v22 = vsel %vm1160_vm4, %v1167_v21, 0.0 }
 0x1d4   : >> { %1169 = vadd.xlane.f32.xlu0 %v1168_v22 }
 0x261   : >> { %v1170_v26 = vpop.xlane.xlu0 %1169 }
 0x262   : >> { %v1171_v27 = vmul.f32 0.03125, %v1170_v26 }
 0x264   : >> { %v1172_v28 = vadd.f32 1e-06, %v1171_v27 }
 0x266   : >> { %2776 = vrsqrt.f32 %v1172_v28 }
 0x270   : >> { %v2777_v29 = vpop.eup %2776 }
 0x271   : >> { %v1174_v31 = vmul.f32 %v2777_v29, %v1166_v20 }
 0x273   : >> { %v1181_v33 = vmul.f32 %v2435_v30, %v1174_v31 }
 0x275   : >> { %v1188_v34 = vadd.f32 %v2436_v32, %v1181_v33 }
 0x277   : >> { %v1189_v35 = vpack.c.bf16 %v1188_v34, %v1188_v34 }
 0x279   : >> { %2591 = vmatmul.mubr.msk.bf16.vlgmr.msra.gmra.mrb[0].mxu0 %vm1160_vm4, %v1189_v35 }
 0x27a   : >> { %2596 = vmatprep.mubr.msk.bf16.mxu0 %vm2877_vm5, %v2876_v23 }
 0x34c   : >> { %v1254_v38 = vpop.f32.mrb[0].mxu0 }
 0x34d   : >> { %v3245_v40 = vadd.f32 %v2439_v36, %v1254_v38  ;;  %v2592_v41 = vpop.f32.mrb[1].mxu0 }
 0x34e   : >> { %v1257_v42 = vpop.f32.mrb[2].mxu0 }
 0x34f   : >> { %1261 = vrot.lane.b32.xlu1 %v3245_v40, %s2878_s7  ;;  %v2593_v44 = vpop.f32.mrb[3].mxu0  ;;  %v1264_v49 = vcombine.high %v3245_v40, %v2876_v23  ;;  %v1271_v55 = vrot.slane %v3245_v40, %v3152_v43 }
 0x351   : >> { %v1278_v52 = vrot.slane %v1264_v49, %v3152_v43 }
 0x353   : >> { %1380 = vrot.lane.b32.xlu1 %v3245_v40, %s2879_s4 }
 0x3c1   : >> { %v3249_v45 = vpop.permute.xlu1 %1261 }
 0x3c2   : >> { %1382 = vrot.lane.b32.xlu0 %v3249_v45, %s2879_s4  ;;  %v1279_v46 = vcombine.high %v3249_v45, %v2876_v23  ;;  %v1286_v53 = vrot.slane %v3249_v45, %v3152_v43 }
 0x3c4   : >> { %v1293_v50 = vrot.slane %v1279_v46, %v3152_v43  ;;  %v1294_v60 = vcombine.low %v1271_v55, %v1286_v53  ;;  %v1295_v61 = vcombine.high %v1271_v55, %v1286_v53 }
 0x3c5   : >> { %v1381_v54 = vpop.permute.xlu1 %1380 }
 0x3c6   : >> { %v1310_v56 = vcombine.low %v1278_v52, %v1293_v50  ;;  %v1311_v57 = vcombine.high %v1278_v52, %v1293_v50  ;;  %v1386_v58 = vcombine.high %v1381_v54, %v2876_v23  ;;  %v1393_v63 = vrot.slane %v1381_v54, %v3152_v43 }
 0x3c7   : >> { %v1302_v8 = vrot.slane %v1294_v60, %v3264_v59  ;;  %v1309_v9 = vrot.slane %v1295_v61, %v3264_v59 }
 0x3c8   : >> { %v1318_v2 = vrot.slane %v1310_v56, %v3264_v59  ;;  %v1325_v3 = vrot.slane %v1311_v57, %v3264_v59  ;;  %v1400_v4 = vrot.slane %v1386_v58, %v3152_v43 }
 0x3c9   : >> { %v1330_v21 = vcombine.low %v1302_v8, %v1309_v9  ;;  %v2443_v22 = vcombine.high %v1302_v8, %v1309_v9 }
 0x3ca   : >> { %v1346_v14 = vcombine.low %v1318_v2, %v1325_v3  ;;  %v2444_v15 = vcombine.high %v1318_v2, %v1325_v3 }
 0x3cb   : >> { %v1337_v33 = vrot.slane %v1330_v21, %v3152_v43  ;;  %v1345_v34 = vrot.slane %v2443_v22, %v3152_v43 }
 0x3cc   : >> { %v1353_v28 = vrot.slane %v1346_v14, %v3152_v43  ;;  %v1361_v29 = vrot.slane %v2444_v15, %v3152_v43 }
 0x3cd   : >> { %v1362_v42 = vcombine.low %v1337_v33, %v1345_v34 }
 0x3ce   : >> { %v1370_v36 = vcombine.low %v1353_v28, %v1361_v29 }
 0x3cf   : >> { %v1369_v49 = vrot.slane %v1362_v42, %v3264_v59 }
 0x3d0   : >> { %v1377_v47 = vrot.slane %v1370_v36, %v3264_v59 }
 0x3d2   : >> { %v1378_v51 = vcombine.low %v1369_v49, %v1377_v47  ;;  %v1379_v55 = vcombine.high %v1369_v49, %v1377_v47 }
 0x3d4   : >> { %v1624_v53 = vpack.c.bf16 %v1378_v51, %v1378_v51  ;;  %v1625_v56 = vpack.c.bf16 %v1379_v55, %v1379_v55 }
 0x434   : >> { %v1383_v62 = vpop.permute.xlu0 %1382 }
 0x435   : >> { %v1401_v0 = vcombine.high %v1383_v62, %v2876_v23  ;;  %v1408_v1 = vrot.slane %v1383_v62, %v3152_v43 }
 0x437   : >> { %v1415_v5 = vrot.slane %v1401_v0, %v3152_v43  ;;  %v1416_v6 = vcombine.low %v1393_v63, %v1408_v1  ;;  %v1417_v7 = vcombine.high %v1393_v63, %v1408_v1 }
 0x439   : >> { %v1424_v10 = vrot.slane %v1416_v6, %v3264_v59  ;;  %v1431_v11 = vrot.slane %v1417_v7, %v3264_v59  ;;  %v1432_v12 = vcombine.low %v1400_v4, %v1415_v5  ;;  %v1433_v13 = vcombine.high %v1400_v4, %v1415_v5 }
 0x43b   : >> { %v1440_v17 = vrot.slane %v1432_v12, %v3264_v59  ;;  %v1447_v18 = vrot.slane %v1433_v13, %v3264_v59  ;;  %v1452_v19 = vcombine.low %v1424_v10, %v1431_v11  ;;  %v2445_v20 = vcombine.high %v1424_v10, %v1431_v11 }
 0x43d   : >> { %v1459_v24 = vrot.slane %v1452_v19, %v3152_v43  ;;  %v1467_v25 = vrot.slane %v2445_v20, %v3152_v43  ;;  %v1468_v26 = vcombine.low %v1440_v17, %v1447_v18  ;;  %v2446_v27 = vcombine.high %v1440_v17, %v1447_v18 }
 0x43f   : >> { %v1475_v30 = vrot.slane %v1468_v26, %v3152_v43  ;;  %v1483_v31 = vrot.slane %v2446_v27, %v3152_v43  ;;  %v1484_v32 = vcombine.low %v1459_v24, %v1467_v25 }
 0x441   : >> { %v1492_v35 = vcombine.low %v1475_v30, %v1483_v31  ;;  %v1491_v38 = vrot.slane %v1484_v32, %v3264_v59 }
 0x443   : >> { %v1499_v41 = vrot.slane %v1492_v35, %v3264_v59 }
 0x445   : >> { %v1500_v44 = vcombine.low %v1491_v38, %v1499_v41  ;;  %v1501_v50 = vcombine.high %v1491_v38, %v1499_v41 }
 0x447   : >> { %v1626_v46 = vpack.c.bf16 %v1500_v44, %v1500_v44  ;;  %v1627_v52 = vpack.c.bf16 %v1501_v50, %v1501_v50 }
 0x449   : >> { %v1633_v48 = vsel %vm1628_vm6, %v1626_v46, 0  ;;  %v1679_v54 = vsel %vm1628_vm6, %v1627_v52, 0 }
 0x44a   : >> { %2595 = vmatpush3.bf16.xpose.msra.mxu0 %v1633_v48 }
 0x44b   : >> { %2600 = vmatprep.subr.bf16.mxu0 %v2876_v23 }
 0x451   : >> { %2597 = vmatmul.mubr.msk.bf16.vlgmr.msra.gmra.mrb[4].mxu0 %vm1628_vm6, %v1624_v53 }
 0x452   : >> { %2601 = vmatpush3.bf16.xpose.msra.mxu0 %v1679_v54  ;;  %2602 = vmatprep.mubr.msk.bf16.mxu0 %vm2877_vm5, %v2876_v23 }
 0x453   : >> { %2612 = vmatprep.subr.bf16.mxu0 %v2876_v23 }
 0x459   : >> { %2603 = vmatmul.mubr.msk.bf16.vlgmr.msra.gmra.mrb[8].mxu0 %vm1628_vm6, %v1625_v56 }
 0x45a   : >> { %2614 = vmatprep.mubr.msk.bf16.mxu0 %vm2877_vm5, %v2876_v23 }
 0x524   : >> { %v1669_v57 = vpop.f32.mrb[4].mxu0 }
 0x525   : >> { %v1670_v58 = vadd.f32 %v1669_v57, %v3149_v39  ;;  %v2598_v60 = vpop.f32.mrb[5].mxu0 }
 0x526   : >> { %v1672_v61 = vpop.f32.mrb[6].mxu0 }
 0x527   : >> { %v2599_v62 = vpop.f32.mrb[7].mxu0  ;;  %v1722_v63 = vsel %vm1721_vm7, %v1670_v58, -inf }
 0x528   : >> { %1723 = vmax.xlane.f32.xlu1 %v1722_v63 }
 0x52c   : >> { %v1715_v0 = vpop.f32.mrb[8].mxu0 }
 0x52d   : >> { %v1716_v1 = vadd.f32 %v1715_v0, %v3149_v39  ;;  %v2604_v2 = vpop.f32.mrb[9].mxu0  ;;  %v2764_v0 = vld [vmem:[%s3221_s2] sm:$0xff]  }
 0x52e   : >> { %v1718_v3 = vpop.f32.mrb[10].mxu0 }
 0x52f   : >> { %v2605_v4 = vpop.f32.mrb[11].mxu0  ;;  %v1725_v5 = vsel %vm1721_vm7, %v1716_v1, -inf }
 0x530   : >> { %1726 = vmax.xlane.f32.xlu0 %v1725_v5 }
 0x546   : >> { %1504 = vrot.lane.b32.xlu0 %v3249_v45, %s2881_s30 }
 0x5b5   : >> { %v1724_v6 = vpop.xlane.xlu1 %1723 }
 0x5b6   : >> { %v1728_v7 = vsub.f32 %v1670_v58, %v1724_v6 }
 0x5b8   : >> { %v1730_v8 = vmul.f32 1.442695, %v1728_v7 }
 0x5ba   : >> { %2778 = vpow2.f32 %v1730_v8 }
 0x5bd   : >> { %v1727_v9 = vpop.xlane.xlu0 %1726 }
 0x5be   : >> { %v1729_v10 = vsub.f32 %v1716_v1, %v1727_v9 }
 0x5c0   : >> { %v1732_v11 = vmul.f32 1.442695, %v1729_v10 }
 0x5c1   : >> { %v1505_v45 = vpop.permute.xlu0 %1504 }
 0x5c2   : >> { %2780 = vpow2.f32 %v1732_v11  ;;  %v1523_v19 = vcombine.high %v1505_v45, %v2876_v23  ;;  %v1530_v21 = vrot.slane %v1505_v45, %v3152_v43 }
 0x5c4   : >> { %v2779_v12 = vpop.eup %2778  ;;  %v1537_v25 = vrot.slane %v1523_v19, %v3152_v43 }
 0x5c5   : >> { %v1734_v13 = vsel %vm1721_vm7, %v2779_v12, 0.0 }
 0x5c6   : >> { %1735 = vadd.xlane.f32.xlu1 %v1734_v13 }
 0x5cc   : >> { %v2781_v14 = vpop.eup %2780 }
 0x5cd   : >> { %v1737_v15 = vsel %vm1721_vm7, %v2781_v14, 0.0 }
 0x5ce   : >> { %1738 = vadd.xlane.f32.xlu1 %v1737_v15 }
 0x5df   : >> { %1502 = vrot.lane.b32.xlu1 %v3245_v40, %s2881_s30  ;;  %s3379_s30 = scalar_lea.vmem %s3498_s16, %s2486_s24  ;;  %s2080_s24 = scalar_lea.vmem %s3497_s15, %s2870_s1 }
 0x653   : >> { %v1736_v17 = vpop.xlane.xlu1 %1735 }
 0x654   : >> { %2782 = vrcp.f32 %v1736_v17 }
 0x65b   : >> { %v1739_v18 = vpop.xlane.xlu1 %1738 }
 0x65c   : >> { %2784 = vrcp.f32 %v1739_v18 }
 0x65e   : >> { %v2783_v49 = vpop.eup %2782 }
 0x65f   : >> { %v1503_v20 = vpop.permute.xlu1 %1502  ;;  %v1742_v58 = vmul.f32 %v2783_v49, %v2779_v12 }
 0x660   : >> { %v1508_v22 = vcombine.high %v1503_v20, %v2876_v23  ;;  %v1515_v24 = vrot.slane %v1503_v20, %v3152_v43 }
 0x661   : >> { %v1744_v62 = vpack.c.bf16 %v1742_v58, %v1742_v58 }
 0x662   : >> { %v1522_v26 = vrot.slane %v1508_v22, %v3152_v43  ;;  %v1538_v27 = vcombine.low %v1515_v24, %v1530_v21  ;;  %v1539_v28 = vcombine.high %v1515_v24, %v1530_v21  ;;  %v2765_v21 = vld [vmem:[%s3221_s2 + $0x8] sm:$0xff]   ;;  %s2882_s2 = smov 16  }
 0x664   : >> { %v1546_v40 = vrot.slane %v1538_v27, %v3264_v59  ;;  %v1553_v29 = vrot.slane %v1539_v28, %v3264_v59  ;;  %v1554_v30 = vcombine.low %v1522_v26, %v1537_v25  ;;  %v1555_v31 = vcombine.high %v1522_v26, %v1537_v25 }
 0x666   : >> { %v1562_v32 = vrot.slane %v1554_v30, %v3264_v59  ;;  %v1569_v33 = vrot.slane %v1555_v31, %v3264_v59  ;;  %v1574_v34 = vcombine.low %v1546_v40, %v1553_v29  ;;  %v2447_v35 = vcombine.high %v1546_v40, %v1553_v29  ;;  %v2785_v52 = vpop.eup %2784 }
 0x667   : >> { %v1743_v55 = vmul.f32 %v2785_v52, %v2781_v14 }
 0x668   : >> { %v1581_v36 = vrot.slane %v1574_v34, %v3152_v43  ;;  %v1589_v38 = vrot.slane %v2447_v35, %v3152_v43  ;;  %v1590_v41 = vcombine.low %v1562_v32, %v1569_v33  ;;  %v2448_v42 = vcombine.high %v1562_v32, %v1569_v33 }
 0x669   : >> { %v1745_v63 = vpack.c.bf16 %v1743_v55, %v1743_v55 }
 0x66a   : >> { %v1597_v44 = vrot.slane %v1590_v41, %v3152_v43  ;;  %v1605_v46 = vrot.slane %v2448_v42, %v3152_v43  ;;  %v1606_v47 = vcombine.low %v1581_v36, %v1589_v38 }
 0x66c   : >> { %v1614_v48 = vcombine.low %v1597_v44, %v1605_v46  ;;  %v1613_v50 = vrot.slane %v1606_v47, %v3264_v59  ;;  %v2460_v47 = vld [vmem:[%s2032_s21] ss:$0 sm:$0xff] }
 0x66e   : >> { %v1621_v51 = vrot.slane %v1614_v48, %v3264_v59 }
 0x670   : >> { %v1622_v53 = vcombine.low %v1613_v50, %v1621_v51  ;;  %v1623_v54 = vcombine.high %v1613_v50, %v1621_v51 }
 0x672   : >> { %v1746_v56 = vpack.c.bf16 %v1622_v53, %v1622_v53  ;;  %v1747_v57 = vpack.c.bf16 %v1623_v54, %v1623_v54 }
 0x674   : >> { %v1753_v60 = vsel %vm1751_vm8, %v1746_v56, 0  ;;  %v1799_v61 = vsel %vm1751_vm8, %v1747_v57, 0 }
 0x675   : >> { %2607 = vmatpush3.bf16.msra.mxu1 %v1753_v60  ;;  %2613 = vmatpush3.bf16.msra.mxu0 %v1799_v61  ;;  %v2766_v61 = vld [vmem:[%s3226_s23] sm:$0xff]  }
 0x676   : >> { %2618 = vmatprep.subr.bf16.mxu1 %v2876_v23  ;;  %2626 = vmatprep.subr.bf16.mxu0 %v2876_v23 }
 0x678   : >> { %2609 = vmatmul.mubr.msk.bf16.vlgmr.msra.gmra.mrb[0].mxu1 %vm1721_vm7, %v1744_v62  ;;  %2615 = vmatmul.mubr.msk.bf16.vlgmr.msra.gmra.mrb[12].mxu0 %vm1721_vm7, %v1745_v63  ;;  %v2767_v62 = vld [vmem:[%s3226_s23 + $0x8] sm:$0xff]  }
 0x679   : >> { %2622 = vmatprep.mubr.msk.bf16.mxu1 %vm2877_vm5, %v2876_v23  ;;  %2630 = vmatprep.mubr.msk.bf16.mxu0 %vm2877_vm5, %v2876_v23  ;;  %v2769_v63 = vld [vmem:[%s3379_s30 + $0x8] sm:$0xff]  }
 0x67a   : >> { %2619 = vmatpush3.bf16.msra.mxu1 %v2764_v0  ;;  %2627 = vmatpush3.bf16.msra.mxu0 %v2766_v61  ;;  %v2770_v0 = vld [vmem:[%s3379_s30 + $0x10] sm:$0xff]  }
 0x67b   : >> { %2620 = vmatprep.subr.bf16.mxu1 %v2876_v23  ;;  %2628 = vmatprep.subr.bf16.mxu0 %v2876_v23 }
 0x67e   : >> { %2621 = vmatpush3.bf16.msra.mxu1 %v2765_v21  ;;  %2629 = vmatpush3.bf16.msra.mxu0 %v2767_v62 }
 0x67f   : >> { %2634 = vmatprep.subr.bf16.mxu1 %v2876_v23 }
 0x74b   : >> { %v1789_v1 = vpop.f32.mrb[0].mxu1  ;;  %v1835_v2 = vpop.f32.mrb[12].mxu0 }
 0x74c   : >> { %v1841_v3 = vcombine.high %v1789_v1, %v2876_v23  ;;  %v1848_v4 = vrot.slane %v1789_v1, %v3152_v43  ;;  %v1856_v5 = vcombine.high %v1835_v2, %v2876_v23  ;;  %v1863_v6 = vrot.slane %v1835_v2, %v3152_v43  ;;  %v2610_v7 = vpop.f32.mrb[1].mxu1  ;;  %v2616_v8 = vpop.f32.mrb[13].mxu0 }
 0x74d   : >> { %v1792_v9 = vpop.f32.mrb[2].mxu1  ;;  %v1838_v10 = vpop.f32.mrb[14].mxu0  ;;  %v2462_v7 = vld [vmem:[%s2044_s26] ss:$0 sm:$0xff] }
 0x74e   : >> { %v1855_v11 = vrot.slane %v1841_v3, %v3152_v43  ;;  %v1870_v12 = vrot.slane %v1856_v5, %v3152_v43  ;;  %v1871_v13 = vcombine.low %v1848_v4, %v1863_v6  ;;  %v1872_v14 = vcombine.high %v1848_v4, %v1863_v6  ;;  %v2611_v15 = vpop.f32.mrb[3].mxu1  ;;  %v2617_v17 = vpop.f32.mrb[15].mxu0  ;;  %v2461_v5 = vld [vmem:[%s2042_s29] ss:$0 sm:$0xff]  ;;  %s2264_s29 = scalar_lea.vmem %s3500_s18, %s2870_s1 }
 0x74f   : >> { %v2775_v15 = vld [vmem:[%s3379_s30 + $0x38] sm:$0xff]   ;;  %v2464_v17 = vld [vmem:[%s2080_s24] ss:$0 sm:$0xff] }
 0x750   : >> { %v1879_v45 = vrot.slane %v1871_v13, %v3264_v59  ;;  %v1886_v18 = vrot.slane %v1872_v14, %v3264_v59  ;;  %v1887_v19 = vcombine.low %v1855_v11, %v1870_v12  ;;  %v1888_v20 = vcombine.high %v1855_v11, %v1870_v12  ;;  %v2771_v11 = vld [vmem:[%s3379_s30 + $0x18] sm:$0xff]   ;;  %v2772_v12 = vld [vmem:[%s3379_s30 + $0x20] sm:$0xff]   ;;  %v2773_v13 = vld [vmem:[%s3379_s30 + $0x28] sm:$0xff]  }
 0x751   : >> { %v2774_v14 = vld [vmem:[%s3379_s30 + $0x30] sm:$0xff]  }
 0x752   : >> { %v1895_v22 = vrot.slane %v1887_v19, %v3264_v59  ;;  %v1902_v24 = vrot.slane %v1888_v20, %v3264_v59  ;;  %v1907_v25 = vcombine.low %v1879_v45, %v1886_v18  ;;  %v2453_v26 = vcombine.high %v1879_v45, %v1886_v18 }
 0x754   : >> { %v1914_v27 = vrot.slane %v1907_v25, %v3152_v43  ;;  %v1922_v28 = vrot.slane %v2453_v26, %v3152_v43  ;;  %v1923_v40 = vcombine.low %v1895_v22, %v1902_v24  ;;  %v2454_v29 = vcombine.high %v1895_v22, %v1902_v24 }
 0x756   : >> { %v1930_v30 = vrot.slane %v1923_v40, %v3152_v43  ;;  %v1938_v31 = vrot.slane %v2454_v29, %v3152_v43  ;;  %v1939_v32 = vcombine.low %v1914_v27, %v1922_v28  ;;  %v2479_v29 = vld [vmem:[%s2264_s29] ss:$0 sm:$0xff] }
 0x758   : >> { %v1947_v33 = vcombine.low %v1930_v30, %v1938_v31  ;;  %v1946_v34 = vrot.slane %v1939_v32, %v3264_v59 }
 0x75a   : >> { %v1954_v35 = vrot.slane %v1947_v33, %v3264_v59  ;;  %v2456_v59 = vld [vmem:[%s1969_s27] ss:$0 sm:$0xff] }
 0x75c   : >> { %v1956_v36 = vcombine.high %v1946_v34, %v1954_v35  ;;  %v1955_v38 = vcombine.low %v1946_v34, %v1954_v35 }
 0x75e   : >> { %1958 = vrot.lane.b32.xlu1 %v1956_v36, %s2882_s2 }
 0x7d0   : >> { %v1959_v41 = vpop.permute.xlu1 %1958 }
 0x7d1   : >> { %v1961_v42 = vsel %vm1628_vm6, %v1955_v38, %v1959_v41 }
 0x7d2   : >> { %v1962_v44 = vpack.c.bf16 %v1961_v42, %v1961_v42 }
 0x7d4   : >> { %2623 = vmatmul.mubr.msk.bf16.vlgmr.msra.gmra.mrb[4].mxu1 %vm1160_vm4, %v1962_v44 }
 0x7d5   : >> { %2650 = vmatprep.mubr.msk.bf16.mxu1 %vm2877_vm5, %v2876_v23 }
 0x8a7   : >> { %v2026_v46 = vpop.f32.mrb[4].mxu1 }
 0x8a8   : >> { %v2027_v48 = vadd.f32 %v2456_v59, %v2026_v46  ;;  %v2624_v49 = vpop.f32.mrb[5].mxu1 }
 0x8a9   : >> { %v2029_v50 = vpop.f32.mrb[6].mxu1 }
 0x8aa   : >> { %v2040_v51 = vmul.f32 %v2460_v47, %v2027_v48  ;;  %v2625_v52 = vpop.f32.mrb[7].mxu1 }
 0x8ac   : >> { %v3366_v53 = vadd.f32 %v2866_v16, %v2040_v51  ;;  %v2768_v16 = vld [vmem:[%s3379_s30] sm:$0xff]   ;;  %s2168_s30 = scalar_lea.vmem %s3499_s17, %s2870_s1  ;;  %s1154_s1 = sadd.s32 1, %s2870_s1  }
 0x8ad   : >> { %2635 = vmatpush3.bf16.msra.mxu1 %v2768_v16  ;;  %v2470_v28 = vld [vmem:[%s2168_s30] ss:$0 sm:$0xff]  ;;  %p1151_p11 = scmp.ge.s32.totalorder %s1154_s1, 2  }
 0x8ae   : >> { %v2046_v54 = vsel %vm1160_vm4, %v3366_v53, 0.0  ;;  %2636 = vmatprep.subr.bf16.mxu1 %v2876_v23  ;;  %vm2276_vm9 = vcmask (%p1151_p11), 253952   ;;  %v2274_v39 = vld [vmem:[%s3501_s19] sm:$0x1] (%p1151_p11)  ;;  %s2480_s0 = sshll.u32 (%p1151_p11), %s3015_s3, 4  ;;  %s2307_s21 = sshll.u32 (%p1151_p11), %s3192_s28, 4  ;;  %s3438_s21 = int_to_ptr.vmem [resolvable:$true] %s2307_s21 }
 0x8af   : >> { %2047 = vadd.xlane.f32.xlu1 %v2046_v54  ;;  %v2275_v49 = vld [vmem:[%s3502_s20] sm:$0x1] (%p1151_p11)  ;;  %s3538_s4 = sld [smem:[#allocation18_spill]] (%p1151_p11)  ;;  %s3539_s23 = sand.u32 (%p1151_p11), 1, %s2854_s25  }
 0x8b0   : > { %s2295_s2 = scalar_lea.sflag (%p1151_p11), [#allocation3], %s3539_s23  ;;  %s2792_s29 = scalar_lea.vmem (%p1151_p11), %s3438_s21, 16 }
 0x8b1   : >> { %2637 = vmatpush3.bf16.msra.mxu1 %v2769_v63  ;;  %p2793_p12 = scmp.ne.s32.totalorder (%p1151_p11), %s3438_s21, %s2792_s29  ;;  %s2883_s3 = smov (%p1151_p11), [#allocation2]  }
 0x8b2   : >> { %2638 = vmatprep.subr.bf16.mxu1 %v2876_v23  ;;  %s2796_s1 = sshll.u32 (%p1151_p11), %s2883_s3, 4  ;;  %s2797_s1 = int_to_ptr.vmem [resolvable:$false] %s2796_s1 }
 0x8b3   : > { %p2794_p13 = pnand (%p1151_p11), %p2793_p12, %p3032_p5  ;;  %s2798_s22 = scalar_lea.vmem (%p1151_p11), %s2797_s1, 32 }
 0x8b4   : > { %p2799_p1 = scmp.lt.s32.totalorder (%p1151_p11), %s3438_s21, %s2797_s1  ;;  %p2800_p2 = scmp.lt.s32.totalorder (%p1151_p11), %s2798_s22, %s2792_s29 }
 0x8b5   : >> { %2639 = vmatpush3.bf16.msra.mxu1 %v2770_v0  ;;  %s3436_s30 = scalar_lea.hbm (%p1151_p11), %s3538_s4, %s2480_s0  ;;  %p2795_p0 = pneg (%p1151_p11), %p2794_p13 }
 0x8b6   : >> { %2640 = vmatprep.subr.bf16.mxu1 %v2876_v23  ;;  %p2801_p3 = por (%p1151_p11), %p2800_p2, %p2799_p1 }
 0x8b8   : > { %p2802_p4 = pnand (%p1151_p11), %p2801_p3, %p2795_p0 }
 0x8b9   : >> { %2641 = vmatpush3.bf16.msra.mxu1 %v2771_v11 }
 0x8ba   : >> { %2642 = vmatprep.subr.bf16.mxu1 %v2876_v23 }
 0x8bd   : >> { %2643 = vmatpush3.bf16.msra.mxu1 %v2772_v12 }
 0x8be   : >> { %2644 = vmatprep.subr.bf16.mxu1 %v2876_v23 }
 0x8c1   : >> { %2645 = vmatpush3.bf16.msra.mxu1 %v2773_v13 }
 0x8c2   : >> { %2646 = vmatprep.subr.bf16.mxu1 %v2876_v23 }
 0x8c5   : >> { %2647 = vmatpush3.bf16.msra.mxu1 %v2774_v14 }
 0x8c6   : >> { %2648 = vmatprep.subr.bf16.mxu1 %v2876_v23 }
 0x8c9   : >> { %2649 = vmatpush3.bf16.msra.mxu1 %v2775_v15 }
 0x93c   : >> { %v2048_v55 = vpop.xlane.xlu1 %2047 }
 0x93d   : >> { %v2049_v56 = vmul.f32 0.03125, %v2048_v55 }
 0x93f   : >> { %v2050_v57 = vsub.f32 %v3366_v53, %v2049_v56 }
 0x941   : >> { %v2051_v58 = vmul.f32 %v2050_v57, %v2050_v57 }
 0x943   : >> { %v2052_v60 = vsel %vm1160_vm4, %v2051_v58, 0.0 }
 0x944   : >> { %2053 = vadd.xlane.f32.xlu0 %v2052_v60 }
 0x9d1   : >> { %v2054_v1 = vpop.xlane.xlu0 %2053 }
 0x9d2   : >> { %v2055_v2 = vmul.f32 0.03125, %v2054_v1 }
 0x9d4   : >> { %v2056_v3 = vadd.f32 1e-06, %v2055_v2 }
 0x9d6   : >> { %2786 = vrsqrt.f32 %v2056_v3 }
 0x9e0   : >> { %v2787_v4 = vpop.eup %2786 }
 0x9e1   : >> { %v2058_v6 = vmul.f32 %v2787_v4, %v2050_v57 }
 0x9e3   : >> { %v2065_v8 = vmul.f32 %v2461_v5, %v2058_v6 }
 0x9e5   : >> { %v2072_v9 = vadd.f32 %v2462_v7, %v2065_v8 }
 0x9e7   : >> { %v2073_v10 = vpack.c.bf16 %v2072_v9, %v2072_v9 }
 0x9e9   : >> { %2631 = vmatmul.mubr.msk.bf16.vlgmr.msra.gmra.mrb[16].mxu0 %vm1160_vm4, %v2073_v10 }
 0xabc   : >> { %v2137_v45 = vpop.f32.mrb[16].mxu0 }
 0xabd   : >> { %v2138_v18 = vadd.f32 %v2464_v17, %v2137_v45  ;;  %v2632_v19 = vpop.f32.mrb[17].mxu0 }
 0xabe   : >> { %v2140_v20 = vpop.f32.mrb[18].mxu0 }
 0xabf   : >> { %v2144_v21 = vmul.f32 0.70710677, %v2138_v18  ;;  %v2633_v22 = vpop.f32.mrb[19].mxu0  ;;  %v2143_v25 = vmul.f32 0.5, %v2138_v18 }
 0xac1   : >> { %2788 = verf.f32 %v2144_v21 }
 0xacb   : >> { %v2789_v24 = vpop.eup %2788 }
 0xacc   : >> { %v2146_v26 = vadd.f32 1.0, %v2789_v24 }
 0xace   : >> { %v2147_v23 = vmul.f32 %v2146_v26, %v2143_v25 }
 0xad0   : >> { %v2148_v27 = vpack.c.bf16 %v2147_v23, %v2147_v23 }
 0xad2   : >> { %2651 = vmatmul.mubr.bf16.vlgmr.msra.gmra.mrb[8].mxu1 %v2148_v27 }
 0xba5   : >> { %v2258_v40 = vpop.f32.mrb[8].mxu1 }
 0xba6   : >> { %v2259_v30 = vadd.f32 %v2470_v28, %v2258_v40  ;;  %v2652_v31 = vpop.f32.mrb[9].mxu1  ;;  %1153 = sbr.rel (!%p1151_p11) target bundleno = 317 (0x13d), region = 160 }
 0xba7   : >> { %v2261_v32 = vpop.f32.mrb[10].mxu1 }
 0xba8   : >> { %v2272_v33 = vmul.f32 %v2479_v29, %v2259_v30  ;;  %v2653_v34 = vpop.f32.mrb[11].mxu1 }
 0xbaa   : >> { %v2273_v35 = vadd.f32 %v2272_v33, %v3366_v53  }
 0xbac   : >> { %v3537_v16 = vmov %v2273_v35  ;;  %v2277_v36 = vsel (%p1151_p11), %vm2276_vm9, %v2273_v35, 0.0 }
 0xbad   : > { %2278 = vadd.xlane.f32.xlu0 %v2277_v36 }
 0xc3a   : > { %v2279_v38 = vpop.xlane.xlu0 %2278 }
 0xc3b   : > { %v2281_v41 = vmul.f32 0.03125, %v2279_v38 }
 0xc3d   : > { %v2282_v42 = vsub.f32 %v2273_v35, %v2281_v41 }
 0xc3f   : > { %v2283_v44 = vmul.f32 %v2282_v42, %v2282_v42 }
 0xc41   : > { %v2284_v59 = vsel %vm2276_vm9, %v2283_v44, 0.0 }
 0xc42   : > { %2285 = vadd.xlane.f32.xlu0 %v2284_v59 }
 0xccf   : > { %v2286_v46 = vpop.xlane.xlu0 %2285 }
 0xcd0   : > { %v2287_v47 = vmul.f32 0.03125, %v2286_v46 }
 0xcd2   : > { %v2288_v48 = vadd.f32 1e-06, %v2287_v47 }
 0xcd4   : > { %2790 = vrsqrt.f32 %v2288_v48 }
 0xcde   : > { %v2791_v37 = vpop.eup %2790 }
 0xcdf   : > { %v2290_v43 = vmul.f32 %v2791_v37, %v2282_v42 }
 0xce1   : > { %v2291_v50 = vmul.f32 %v2290_v43, %v2274_v39 }
 0xce3   : > { %v2292_v51 = vadd.f32 %v2291_v50, %v2275_v49 }
 0xce5   : > { %2293 = vst.msk [vmem:[%s3192_s28] sm:$0x1] %vm2276_vm9, %v2292_v51 }
 0xce6   : > { %2805 = shalt.err (!%p2802_p4)
}
 0xce7   : > { %s2806_s28 = scalar_lea.hbm %s3436_s30, 16  ;;  %s2810_s0 = scalar_lea.hbm %s3538_s4, 32 }
 0xce8   : > { %p2807_p7 = scmp.ne.s32.totalorder %s3436_s30, %s2806_s28  ;;  %p2811_p10 = scmp.lt.u32.totalorder %s3436_s30, %s3538_s4 }
 0xce9   : > { %p2812_p11 = scmp.lt.u32.totalorder %s2810_s0, %s2806_s28  ;;  %p2814_p13 = scmp.lt.u32.totalorder %s2806_s28, %s3436_s30 }
 0xcea   : > { %p2808_p8 = pnand %p2807_p7, %p3032_p5 }
 0xceb   : > { %p2813_p12 = por %p2812_p11, %p2811_p10 }
 0xcec   : > { %p2809_p9 = pneg %p2808_p8 }
 0xced   : > { %p2815_p0 = por %p2814_p13, %p2813_p12 }
 0xcef   : > { %p2816_p1 = pnand %p2815_p0, %p2809_p9 }
 0xcf1   : > { %2819 = shalt.err (!%p2816_p1)
}
 0xcf2   : > { %2655 = dma.vmem_to_hbm [thread:$0]  (%p3032_p5), %s3438_s21, 16, %s3436_s30, %s2295_s2  }
 0xcf3 PF: > { %s3540_s23 = sld [smem:[#allocation7_spill]]  ;;  %s3541_s29 = sld [smem:[#allocation5_spill]] }
 0xcf9   : > { %p2661_p2 = scmp.ge.s32.totalorder %s3540_s23, 2  ;;  %s2319_s1 = sand.u32 1, %s3541_s29  }
 0xcfa   : > { %s2320_s22 = scalar_lea.sflag [#allocation3], %s2319_s1 }
 0xcfb   : > { %p2658_p3 = pnand %p2661_p2, %p3036_p6 }
 0xcfd   : > { %2845 = dma.done.wait (!%p2658_p3), %s2320_s22, 16  }
 0xcfe   : > { %2847 = vsyncadd (!%p2658_p3), %s2320_s22, 4294967280  ;;  %s3543_s27 = sld [smem:[#allocation8_spill]]  ;;  %s3544_s28 = sld [smem:[#allocation6_spill]] }
 0xcff   : > { %s3545_s26 = sld [smem:[#allocation9_spill]]  ;;  %s3546_s2 = smov %s2854_s25 }
 0xd04   : > { %p31_p4 = scmp.ge.s32.totalorder %s3543_s27, 4   ;;  %s3547_s25 = smov %s3544_s28 }
 0xd06   :  { %33 = sbr.rel (!%p31_p4) target bundleno = 12 (0xc), region = 171 }
 0xd0d   :  { %2324 = vsyncpa [#allocation3], 1 }
 0xd0e   :  { %2326 = vsyncpa [#allocation3 + $0x1], 1 }

</bundles_post_ra>
